<compile_context>
chip_gen: v5e
topology: v5e:2x2
jax: 0.10.0
libtpu: 0.0.40
codegen_flags: <defaults>
</compile_context>

<pallas_src>
import math
from functools import partial

import jax
import jax.numpy as jnp
from jax import lax
from jax.experimental import pallas as pl
from jax.experimental.pallas import tpu as pltpu


# --------------------------------------------------------------------------
# Helpers
# --------------------------------------------------------------------------
def _round_up(n, m=128):
    return ((n + m - 1) // m) * m


def _pad2(w, rows, cols):
    return jnp.pad(w, ((0, rows - w.shape[0]), (0, cols - w.shape[1])))


def _vmem_limit_bytes():
    # Per-generation sizing (v7x: 64 MiB physical VMEM, v5e/v6e: 128 MiB).
    try:
        cap = pltpu.get_tpu_info().vmem_capacity_bytes
        return int(min(cap * 3 // 4, 100 * 1024 * 1024))
    except Exception:
        return 32 * 1024 * 1024


# --------------------------------------------------------------------------
# Fused per-pair CNSYN scoring kernel (one grid step == one <set, inst> pair).
#   x_ref   : (1, S+1, Ep)    bf16  rows 0..S-1 = set tokens, row S = instance
#   ctx_ref : (K, 1, S+1, Ep) bf16  context embeddings, K on the leading axis
#   mask_ref: (1, S, 1)       f32   set padding mask
#   weights : lane-padded Q1 / Q1Hat / Q2 / Q2Hat parameters (VMEM resident)
#   out_ref : (1, 8, 128)     f32   lane-dense score slab (score at [0, 0, 0])
# --------------------------------------------------------------------------
def _cnsyn_kernel(x_ref, ctx_ref, mask_ref,
                  q1w1_ref, q1w2_ref, q1b2_ref,
                  q1hw1_ref, q1hw2_ref, q1hb2_ref,
                  q2w1_ref, q2b1_ref, q2w2_ref, q2b2_ref, q2w3_ref, q2b3_ref,
                  q2hw1_ref, q2hb1_ref, q2hw2_ref, q2hb2_ref, q2hw3_ref, q2hb3_ref,
                  out_ref, *, S, K, E, mu, inv_t):
    f32, bf16 = jnp.float32, jnp.bfloat16
    dot = partial(jnp.dot, preferred_element_type=f32)

    def relu(v):
        return jnp.maximum(v, 0.0)

    x = x_ref[0]          # (S+1, Ep) bf16
    mask = mask_ref[0]    # (S, 1)    f32

    # ----- Q1 on set + inst rows (bf16 MXU, f32 accumulate) -----
    h = relu(dot(x, q1w1_ref[...]))                                    # (S+1, Ep)
    h = relu(dot(h.astype(bf16), q1w2_ref[...]) + q1b2_ref[...])       # (S+1, Hp)
    set_embed = jnp.sum(h[:S] * mask, axis=0, keepdims=True)           # masked sum-pool (1, Hp)
    inst_embed = h[S:S + 1]                                            # (1, Hp)

    # ----- context attention (exact torch alpha weighting, reduced form) -----
    #   agg[r] = sum_k ctx[k, r] * (<ctx[k, r], x[r]> / sum_j <ctx[j, r], x[r]>)
    x_f = x.astype(f32)
    dots, denom = [], None
    for k in range(K):                                                 # K small -> unrolled VPU work
        dk = jnp.sum(ctx_ref[k, 0].astype(f32) * x_f, axis=-1, keepdims=True)   # (S+1, 1)
        dots.append(dk)
        denom = dk if denom is None else denom + dk
    inv = pl.reciprocal(denom, approx=True)                            # EUP slot, (S+1, 1)
    agg = None
    for k in range(K):
        term = ctx_ref[k, 0].astype(f32) * (dots[k] * inv)
        agg = term if agg is None else agg + term                      # (S+1, Ep)

    lane = lax.broadcasted_iota(jnp.int32, agg.shape, 1)
    row = lax.broadcasted_iota(jnp.int32, agg.shape, 0)
    agg = jnp.where(lane >= E, 0.0, agg)                   # keep zero lane padding exact (denom~0 case)
    agg = jnp.where((row < S) & jnp.isnan(agg), 0.0, agg)  # torch isnan->0 on set rows only

    # ----- Q1Hat on aggregated-context rows -----
    hh = relu(dot(agg.astype(bf16), q1hw1_ref[...]))
    hh = relu(dot(hh.astype(bf16), q1hw2_ref[...]) + q1hb2_ref[...])   # (S+1, Hp)
    ctx_embed = jnp.sum(hh[:S] * mask, axis=0, keepdims=True)          # (1, Hp)
    ctx_inst_embed = hh[S:S + 1]                                       # (1, Hp)

    # ----- Q2 / Q2Hat: (set ; set+inst) processed as ONE (2, Hp) block each -----
    def q2_mlp(z, w1, b1, w2, b2, w3, b3):
        a = relu(dot(z.astype(bf16), w1[...]) + b1[...])
        a = relu(dot(a.astype(bf16), w2[...]) + b2[...])
        # TODO(synk): nn.Dropout treated as identity (eval-mode semantics).
        return jnp.sum(a * w3[...], axis=-1, keepdims=True) + b3[...]  # (2, 1)

    q2 = q2_mlp(jnp.concatenate([set_embed, set_embed + inst_embed], axis=0),
                q2w1_ref, q2b1_ref, q2w2_ref, q2b2_ref, q2w3_ref, q2b3_ref)
    q2h = q2_mlp(jnp.concatenate([ctx_embed, ctx_embed + ctx_inst_embed], axis=0),
                 q2hw1_ref, q2hb1_ref, q2hw2_ref, q2hb2_ref, q2hw3_ref, q2hb3_ref)

    # score_diff = ((1-mu)*(Q2(set+inst)-Q2(set)) + mu*(Q2Hat(ctx+inst)-Q2Hat(ctx))) / T
    score = ((1.0 - mu) * (q2[1:2] - q2[0:1]) + mu * (q2h[1:2] - q2h[0:1])) * inv_t   # (1, 1)
    out_ref[...] = jnp.broadcast_to(score.reshape(1, 1, 1), out_ref.shape)


# --------------------------------------------------------------------------
# One-time parameter preparation (padding + bf16 cast OUTSIDE the jitted step).
# --------------------------------------------------------------------------
def prepare_params(params):
    E = params["emb"].shape[1]
    H = params["q1_w2"].shape[1]
    C = params["q2"][0].shape[1]
    C2 = params["q2"][2].shape[1]
    Ep, Hp, Cp, C2p = _round_up(E), _round_up(H), _round_up(C), _round_up(C2)
    bf16 = jnp.bfloat16

    def pad_q2(p):
        w1, b1, w2, b2, w3, b3 = p
        return (_pad2(w1, Hp, Cp).astype(bf16),
                _pad2(b1.reshape(1, -1), 1, Cp),
                _pad2(w2, Cp, C2p).astype(bf16),
                _pad2(b2.reshape(1, -1), 1, C2p),
                _pad2(w3.reshape(1, -1), 1, C2p),   # stays f32: used on the VPU tail
                b3.reshape(1, 1))

    prepped = {
        "emb_p": jnp.pad(params["emb"], ((0, 0), (0, Ep - E))).astype(bf16),
        "contexArray": params["contexArray"],
        "q1w1": _pad2(params["q1_w1"], Ep, Ep).astype(bf16),
        "q1w2": _pad2(params["q1_w2"], Ep, Hp).astype(bf16),
        "q1b2": _pad2(params["q1_b2"].reshape(1, -1), 1, Hp),
        "q1hw1": _pad2(params["q1h_w1"], Ep, Ep).astype(bf16),
        "q1hw2": _pad2(params["q1h_w2"], Ep, Hp).astype(bf16),
        "q1hb2": _pad2(params["q1h_b2"].reshape(1, -1), 1, Hp),
        "q2": pad_q2(params["q2"]),
        "q2h": pad_q2(params["q2h"]),
    }
    return prepped, E


# --------------------------------------------------------------------------
# Full CNSYN forward (scoring + BCE-with-logits loss + confusion counts).
# --------------------------------------------------------------------------
@partial(jax.jit, static_argnames=("mu", "temperature", "embed_size"))
def cnsyn_forward(prepped, set_ids, inst_ids, labels, *, mu, temperature, embed_size):
    emb_p = prepped["emb_p"]            # (V, Ep) bf16, padded once outside jit
    ctx_arr = prepped["contexArray"]    # (V, K)  int32
    B, S = set_ids.shape
    K = ctx_arr.shape[1]
    Ep = emb_p.shape[1]
    R = S + 1                           # rows per pair: S set tokens + 1 instance

    # ---- gathers (left to XLA). TODO(synk): move in-kernel via scalar-prefetched
    # ids + manual DMA gather to avoid the K*E-wide HBM intermediate at production B*S.
    ids_all = jnp.concatenate([set_ids, inst_ids], axis=1)             # (B, R)
    x = emb_p[ids_all]                                                  # (B, R, Ep) bf16
    ctx_ids = jnp.transpose(ctx_arr[ids_all], (2, 0, 1))                # (K, B, R)
    ctx = emb_p[ctx_ids]                                                # (K, B, R, Ep) bf16
    mask = (set_ids != 0).astype(jnp.float32)[..., None]                # (B, S, 1)

    weights = (prepped["q1w1"], prepped["q1w2"], prepped["q1b2"],
               prepped["q1hw1"], prepped["q1hw2"], prepped["q1hb2"]) \
        + prepped["q2"] + prepped["q2h"]

    def bmap(b):
        return (b, 0, 0)

    in_specs = ([pl.BlockSpec((1, R, Ep), bmap),                         # per-pair token rows
                 pl.BlockSpec((K, 1, R, Ep), lambda b: (0, b, 0, 0)),    # per-pair context rows
                 pl.BlockSpec((1, S, 1), bmap)]                          # per-pair mask
                + [pl.BlockSpec(wt.shape, lambda b: (0, 0))              # weights stay resident
                   for wt in weights])

    kern = partial(_cnsyn_kernel, S=S, K=K, E=embed_size,
                   mu=float(mu), inv_t=float(1.0 / temperature))

    score_slab = pl.pallas_call(
        kern,
        out_shape=jax.ShapeDtypeStruct((B, 8, 128), jnp.float32),       # lane-dense output slab
        grid=(B,),
        in_specs=in_specs,
        out_specs=pl.BlockSpec((1, 8, 128), bmap),
        compiler_params=pltpu.CompilerParams(
            dimension_semantics=("parallel",),     # pairs independent -> both TCs on v7x
            vmem_limit_bytes=_vmem_limit_bytes()),
    )(x, ctx, mask, *weights)

    score_diff = score_slab[:, 0, 0]                                    # (B,)

    # loss_fn == 'self_margin_rank_bce' -> BCEWithLogitsLoss (forward only).
    # TODO(synk): loss.backward() / sklearn confusion_matrix have no Pallas equivalent.
    y = labels.astype(jnp.float32)
    loss = jnp.mean(jnp.maximum(score_diff, 0.0) - score_diff * y
                    + jnp.log1p(jnp.exp(-jnp.abs(score_diff))))
    pred = (score_diff > 0.0).astype(jnp.int32)
    yi = labels.astype(jnp.int32)
    tp = jnp.sum((pred == 1) & (yi == 1))
    tn = jnp.sum((pred == 0) & (yi == 0))
    fp = jnp.sum((pred == 1) & (yi == 0))
    fn = jnp.sum((pred == 0) & (yi == 1))
    return loss, tn, fp, fn, tp, score_diff


# --------------------------------------------------------------------------
if __name__ == "__main__":
    # Small shapes consistent with the module (E=100 and K=10 are hard-coded
    # in the torch forward pass).
    V, E, H, C, K = 50, 100, 64, 48, 10     # vocab, embed, node_hidden, combine
    C2 = C // 2
    B, S = 2, 8                             # batch, set length (inst length = 1)
    MU, TEMPERATURE = 0.3, 1.0

    key = jax.random.PRNGKey(0)
    ks = jax.random.split(key, 16)

    def xavier(k, fi, fo):
        return (jax.random.normal(k, (fi, fo), jnp.float32)
                * math.sqrt(2.0 / (fi + fo)))

    params = {
        "emb": xavier(ks[0], V, E),
        "contexArray": jax.random.randint(ks[1], (V, K), 1, V, dtype=jnp.int32),
        # Q1Layer
        "q1_w1": xavier(ks[2], E, E),
        "q1_w2": xavier(ks[3], E, H),
        "q1_b2": jnp.zeros((H,), jnp.float32),
        # Q1HatLayer
        "q1h_w1": xavier(ks[4], E, E),
        "q1h_w2": xavier(ks[5], E, H),
        "q1h_b2": jnp.zeros((H,), jnp.float32),
        # Q2Layer: (w1,b1,w2,b2,w3,b3)
        "q2": (xavier(ks[6], H, C), jnp.zeros((C,), jnp.float32),
               xavier(ks[7], C, C2), jnp.zeros((C2,), jnp.float32),
               xavier(ks[8], C2, 1), jnp.zeros((1,), jnp.float32)),
        # Q2HatLayer
        "q2h": (xavier(ks[9], H, C), jnp.zeros((C,), jnp.float32),
                xavier(ks[10], C, C2), jnp.zeros((C2,), jnp.float32),
                xavier(ks[11], C2, 1), jnp.zeros((1,), jnp.float32)),
    }

    set_ids = jax.random.randint(ks[12], (B, S), 0, V, dtype=jnp.int32)
    inst_ids = jax.random.randint(ks[13], (B, 1), 1, V, dtype=jnp.int32)
    labels = jax.random.randint(ks[14], (B,), 0, 2, dtype=jnp.int32)

    prepped, embed_size = prepare_params(params)   # pad/cast ONCE, outside the jitted step

    loss, tn, fp, fn, tp, score = cnsyn_forward(
        prepped, set_ids, inst_ids, labels,
        mu=MU, temperature=TEMPERATURE, embed_size=embed_size)
    jax.block_until_ready((loss, tn, fp, fn, tp, score))
    print("KERNEL_OK")
</pallas_src>

<mosaic_0001>
module attributes {stable_mosaic.version = 11 : i64} {
  func.func @_cnsyn_kernel(%arg0: i32, %arg1: memref<1x9x128xbf16, #tpu.memory_space<vmem>>, %arg2: memref<10x1x9x128xbf16, #tpu.memory_space<vmem>>, %arg3: memref<1x8x1xf32, #tpu.memory_space<vmem>>, %arg4: memref<128x128xbf16, #tpu.memory_space<vmem>>, %arg5: memref<128x128xbf16, #tpu.memory_space<vmem>>, %arg6: memref<1x128xf32, #tpu.memory_space<vmem>>, %arg7: memref<128x128xbf16, #tpu.memory_space<vmem>>, %arg8: memref<128x128xbf16, #tpu.memory_space<vmem>>, %arg9: memref<1x128xf32, #tpu.memory_space<vmem>>, %arg10: memref<128x128xbf16, #tpu.memory_space<vmem>>, %arg11: memref<1x128xf32, #tpu.memory_space<vmem>>, %arg12: memref<128x128xbf16, #tpu.memory_space<vmem>>, %arg13: memref<1x128xf32, #tpu.memory_space<vmem>>, %arg14: memref<1x128xf32, #tpu.memory_space<vmem>>, %arg15: memref<1x1xf32, #tpu.memory_space<vmem>>, %arg16: memref<128x128xbf16, #tpu.memory_space<vmem>>, %arg17: memref<1x128xf32, #tpu.memory_space<vmem>>, %arg18: memref<128x128xbf16, #tpu.memory_space<vmem>>, %arg19: memref<1x128xf32, #tpu.memory_space<vmem>>, %arg20: memref<1x128xf32, #tpu.memory_space<vmem>>, %arg21: memref<1x1xf32, #tpu.memory_space<vmem>>, %arg22: memref<1x8x128xf32, #tpu.memory_space<vmem>>) attributes {dimension_semantics = [#tpu.dimension_semantics<parallel>], iteration_bounds = array<i64: 2>, scalar_prefetch = 0 : i64, scratch_operands = 0 : i64, tpu.core_type = #tpu.core_type<tc>, window_params = [{transform_indices = @transform_0, window_bounds = array<i64: 1, 9, 128>}, {transform_indices = @transform_1, window_bounds = array<i64: 10, 1, 9, 128>}, {transform_indices = @transform_2, window_bounds = array<i64: 1, 8, 1>}, {pipeline_mode = #tpu.pipeline_mode<synchronous>, transform_indices = @transform_3, window_bounds = array<i64: 128, 128>}, {pipeline_mode = #tpu.pipeline_mode<synchronous>, transform_indices = @transform_4, window_bounds = array<i64: 128, 128>}, {pipeline_mode = #tpu.pipeline_mode<synchronous>, transform_indices = @transform_5, window_bounds = array<i64: 1, 128>}, {pipeline_mode = #tpu.pipeline_mode<synchronous>, transform_indices = @transform_6, window_bounds = array<i64: 128, 128>}, {pipeline_mode = #tpu.pipeline_mode<synchronous>, transform_indices = @transform_7, window_bounds = array<i64: 128, 128>}, {pipeline_mode = #tpu.pipeline_mode<synchronous>, transform_indices = @transform_8, window_bounds = array<i64: 1, 128>}, {pipeline_mode = #tpu.pipeline_mode<synchronous>, transform_indices = @transform_9, window_bounds = array<i64: 128, 128>}, {pipeline_mode = #tpu.pipeline_mode<synchronous>, transform_indices = @transform_10, window_bounds = array<i64: 1, 128>}, {pipeline_mode = #tpu.pipeline_mode<synchronous>, transform_indices = @transform_11, window_bounds = array<i64: 128, 128>}, {pipeline_mode = #tpu.pipeline_mode<synchronous>, transform_indices = @transform_12, window_bounds = array<i64: 1, 128>}, {pipeline_mode = #tpu.pipeline_mode<synchronous>, transform_indices = @transform_13, window_bounds = array<i64: 1, 128>}, {pipeline_mode = #tpu.pipeline_mode<synchronous>, transform_indices = @transform_14, window_bounds = array<i64: 1, 1>}, {pipeline_mode = #tpu.pipeline_mode<synchronous>, transform_indices = @transform_15, window_bounds = array<i64: 128, 128>}, {pipeline_mode = #tpu.pipeline_mode<synchronous>, transform_indices = @transform_16, window_bounds = array<i64: 1, 128>}, {pipeline_mode = #tpu.pipeline_mode<synchronous>, transform_indices = @transform_17, window_bounds = array<i64: 128, 128>}, {pipeline_mode = #tpu.pipeline_mode<synchronous>, transform_indices = @transform_18, window_bounds = array<i64: 1, 128>}, {pipeline_mode = #tpu.pipeline_mode<synchronous>, transform_indices = @transform_19, window_bounds = array<i64: 1, 128>}, {pipeline_mode = #tpu.pipeline_mode<synchronous>, transform_indices = @transform_20, window_bounds = array<i64: 1, 1>}, {transform_indices = @transform_21, window_bounds = array<i64: 1, 8, 128>}]} {
    %c0 = arith.constant 0 : index
    %c0_0 = arith.constant 0 : index
    %c0_1 = arith.constant 0 : index
    %0 = vector.load %arg1[%c0, %c0_0, %c0_1] : memref<1x9x128xbf16, #tpu.memory_space<vmem>>, vector<1x9x128xbf16>
    %1 = vector.shape_cast %0 : vector<1x9x128xbf16> to vector<9x128xbf16>
    %c0_2 = arith.constant 0 : index
    %c0_3 = arith.constant 0 : index
    %c0_4 = arith.constant 0 : index
    %2 = vector.load %arg3[%c0_2, %c0_3, %c0_4] : memref<1x8x1xf32, #tpu.memory_space<vmem>>, vector<1x8x1xf32>
    %3 = vector.shape_cast %2 : vector<1x8x1xf32> to vector<8x1xf32>
    %c0_5 = arith.constant 0 : index
    %c0_6 = arith.constant 0 : index
    %4 = vector.load %arg4[%c0_5, %c0_6] : memref<128x128xbf16, #tpu.memory_space<vmem>>, vector<128x128xbf16>
    %cst = arith.constant dense<0.000000e+00> : vector<9x128xf32>
    %5 = tpu.matmul %1, %4, %cst {dimension_numbers = #tpu.dot_dimension_numbers<[1], [0], [0], [1], [0, 0, 1, 1], [], []>} : vector<9x128xbf16>, vector<128x128xbf16>, vector<9x128xf32> -> vector<9x128xf32>
    %cst_7 = arith.constant 0.000000e+00 : f32
    %6 = vector.broadcast %cst_7 : f32 to vector<9x128xf32>
    %7 = arith.maximumf %5, %6 : vector<9x128xf32>
    %8 = arith.truncf %7 : vector<9x128xf32> to vector<9x128xbf16>
    %c0_8 = arith.constant 0 : index
    %c0_9 = arith.constant 0 : index
    %9 = vector.load %arg5[%c0_8, %c0_9] : memref<128x128xbf16, #tpu.memory_space<vmem>>, vector<128x128xbf16>
    %cst_10 = arith.constant dense<0.000000e+00> : vector<9x128xf32>
    %10 = tpu.matmul %8, %9, %cst_10 {dimension_numbers = #tpu.dot_dimension_numbers<[1], [0], [0], [1], [0, 0, 1, 1], [], []>} : vector<9x128xbf16>, vector<128x128xbf16>, vector<9x128xf32> -> vector<9x128xf32>
    %c0_11 = arith.constant 0 : index
    %c0_12 = arith.constant 0 : index
    %11 = vector.load %arg6[%c0_11, %c0_12] : memref<1x128xf32, #tpu.memory_space<vmem>>, vector<1x128xf32>
    %12 = vector.broadcast %11 : vector<1x128xf32> to vector<9x128xf32>
    %13 = arith.addf %10, %12 : vector<9x128xf32>
    %cst_13 = arith.constant 0.000000e+00 : f32
    %14 = vector.broadcast %cst_13 : f32 to vector<9x128xf32>
    %15 = arith.maximumf %13, %14 : vector<9x128xf32>
    %16 = vector.extract_strided_slice %15 {offsets = [0, 0], sizes = [8, 128], strides = [1, 1]} : vector<9x128xf32> to vector<8x128xf32>
    %17 = vector.broadcast %3 : vector<8x1xf32> to vector<8x128xf32>
    %18 = arith.mulf %16, %17 : vector<8x128xf32>
    %cst_14 = arith.constant dense<0.000000e+00> : vector<128xf32>
    %19 = vector.multi_reduction <add>, %18, %cst_14 [0] : vector<8x128xf32> to vector<128xf32>
    %20 = vector.shape_cast %19 : vector<128xf32> to vector<1x128xf32>
    %21 = vector.extract_strided_slice %15 {offsets = [8, 0], sizes = [1, 128], strides = [1, 1]} : vector<9x128xf32> to vector<1x128xf32>
    %22 = arith.extf %1 : vector<9x128xbf16> to vector<9x128xf32>
    %c0_15 = arith.constant 0 : index
    %c0_16 = arith.constant 0 : index
    %c0_17 = arith.constant 0 : index
    %c0_18 = arith.constant 0 : index
    %23 = vector.load %arg2[%c0_15, %c0_16, %c0_17, %c0_18] : memref<10x1x9x128xbf16, #tpu.memory_space<vmem>>, vector<1x1x9x128xbf16>
    %24 = vector.shape_cast %23 : vector<1x1x9x128xbf16> to vector<9x128xbf16>
    %25 = arith.extf %24 : vector<9x128xbf16> to vector<9x128xf32>
    %26 = arith.mulf %25, %22 : vector<9x128xf32>
    %cst_19 = arith.constant dense<0.000000e+00> : vector<9xf32>
    %27 = vector.multi_reduction <add>, %26, %cst_19 [1] : vector<9x128xf32> to vector<9xf32>
    %28 = vector.shape_cast %27 : vector<9xf32> to vector<9x1xf32>
    %c1 = arith.constant 1 : index
    %c0_20 = arith.constant 0 : index
    %c0_21 = arith.constant 0 : index
    %c0_22 = arith.constant 0 : index
    %29 = vector.load %arg2[%c1, %c0_20, %c0_21, %c0_22] : memref<10x1x9x128xbf16, #tpu.memory_space<vmem>>, vector<1x1x9x128xbf16>
    %30 = vector.shape_cast %29 : vector<1x1x9x128xbf16> to vector<9x128xbf16>
    %31 = arith.extf %30 : vector<9x128xbf16> to vector<9x128xf32>
    %32 = arith.mulf %31, %22 : vector<9x128xf32>
    %cst_23 = arith.constant dense<0.000000e+00> : vector<9xf32>
    %33 = vector.multi_reduction <add>, %32, %cst_23 [1] : vector<9x128xf32> to vector<9xf32>
    %34 = vector.shape_cast %33 : vector<9xf32> to vector<9x1xf32>
    %35 = arith.addf %28, %34 : vector<9x1xf32>
    %c2 = arith.constant 2 : index
    %c0_24 = arith.constant 0 : index
    %c0_25 = arith.constant 0 : index
    %c0_26 = arith.constant 0 : index
    %36 = vector.load %arg2[%c2, %c0_24, %c0_25, %c0_26] : memref<10x1x9x128xbf16, #tpu.memory_space<vmem>>, vector<1x1x9x128xbf16>
    %37 = vector.shape_cast %36 : vector<1x1x9x128xbf16> to vector<9x128xbf16>
    %38 = arith.extf %37 : vector<9x128xbf16> to vector<9x128xf32>
    %39 = arith.mulf %38, %22 : vector<9x128xf32>
    %cst_27 = arith.constant dense<0.000000e+00> : vector<9xf32>
    %40 = vector.multi_reduction <add>, %39, %cst_27 [1] : vector<9x128xf32> to vector<9xf32>
    %41 = vector.shape_cast %40 : vector<9xf32> to vector<9x1xf32>
    %42 = arith.addf %35, %41 : vector<9x1xf32>
    %c3 = arith.constant 3 : index
    %c0_28 = arith.constant 0 : index
    %c0_29 = arith.constant 0 : index
    %c0_30 = arith.constant 0 : index
    %43 = vector.load %arg2[%c3, %c0_28, %c0_29, %c0_30] : memref<10x1x9x128xbf16, #tpu.memory_space<vmem>>, vector<1x1x9x128xbf16>
    %44 = vector.shape_cast %43 : vector<1x1x9x128xbf16> to vector<9x128xbf16>
    %45 = arith.extf %44 : vector<9x128xbf16> to vector<9x128xf32>
    %46 = arith.mulf %45, %22 : vector<9x128xf32>
    %cst_31 = arith.constant dense<0.000000e+00> : vector<9xf32>
    %47 = vector.multi_reduction <add>, %46, %cst_31 [1] : vector<9x128xf32> to vector<9xf32>
    %48 = vector.shape_cast %47 : vector<9xf32> to vector<9x1xf32>
    %49 = arith.addf %42, %48 : vector<9x1xf32>
    %c4 = arith.constant 4 : index
    %c0_32 = arith.constant 0 : index
    %c0_33 = arith.constant 0 : index
    %c0_34 = arith.constant 0 : index
    %50 = vector.load %arg2[%c4, %c0_32, %c0_33, %c0_34] : memref<10x1x9x128xbf16, #tpu.memory_space<vmem>>, vector<1x1x9x128xbf16>
    %51 = vector.shape_cast %50 : vector<1x1x9x128xbf16> to vector<9x128xbf16>
    %52 = arith.extf %51 : vector<9x128xbf16> to vector<9x128xf32>
    %53 = arith.mulf %52, %22 : vector<9x128xf32>
    %cst_35 = arith.constant dense<0.000000e+00> : vector<9xf32>
    %54 = vector.multi_reduction <add>, %53, %cst_35 [1] : vector<9x128xf32> to vector<9xf32>
    %55 = vector.shape_cast %54 : vector<9xf32> to vector<9x1xf32>
    %56 = arith.addf %49, %55 : vector<9x1xf32>
    %c5 = arith.constant 5 : index
    %c0_36 = arith.constant 0 : index
    %c0_37 = arith.constant 0 : index
    %c0_38 = arith.constant 0 : index
    %57 = vector.load %arg2[%c5, %c0_36, %c0_37, %c0_38] : memref<10x1x9x128xbf16, #tpu.memory_space<vmem>>, vector<1x1x9x128xbf16>
    %58 = vector.shape_cast %57 : vector<1x1x9x128xbf16> to vector<9x128xbf16>
    %59 = arith.extf %58 : vector<9x128xbf16> to vector<9x128xf32>
    %60 = arith.mulf %59, %22 : vector<9x128xf32>
    %cst_39 = arith.constant dense<0.000000e+00> : vector<9xf32>
    %61 = vector.multi_reduction <add>, %60, %cst_39 [1] : vector<9x128xf32> to vector<9xf32>
    %62 = vector.shape_cast %61 : vector<9xf32> to vector<9x1xf32>
    %63 = arith.addf %56, %62 : vector<9x1xf32>
    %c6 = arith.constant 6 : index
    %c0_40 = arith.constant 0 : index
    %c0_41 = arith.constant 0 : index
    %c0_42 = arith.constant 0 : index
    %64 = vector.load %arg2[%c6, %c0_40, %c0_41, %c0_42] : memref<10x1x9x128xbf16, #tpu.memory_space<vmem>>, vector<1x1x9x128xbf16>
    %65 = vector.shape_cast %64 : vector<1x1x9x128xbf16> to vector<9x128xbf16>
    %66 = arith.extf %65 : vector<9x128xbf16> to vector<9x128xf32>
    %67 = arith.mulf %66, %22 : vector<9x128xf32>
    %cst_43 = arith.constant dense<0.000000e+00> : vector<9xf32>
    %68 = vector.multi_reduction <add>, %67, %cst_43 [1] : vector<9x128xf32> to vector<9xf32>
    %69 = vector.shape_cast %68 : vector<9xf32> to vector<9x1xf32>
    %70 = arith.addf %63, %69 : vector<9x1xf32>
    %c7 = arith.constant 7 : index
    %c0_44 = arith.constant 0 : index
    %c0_45 = arith.constant 0 : index
    %c0_46 = arith.constant 0 : index
    %71 = vector.load %arg2[%c7, %c0_44, %c0_45, %c0_46] : memref<10x1x9x128xbf16, #tpu.memory_space<vmem>>, vector<1x1x9x128xbf16>
    %72 = vector.shape_cast %71 : vector<1x1x9x128xbf16> to vector<9x128xbf16>
    %73 = arith.extf %72 : vector<9x128xbf16> to vector<9x128xf32>
    %74 = arith.mulf %73, %22 : vector<9x128xf32>
    %cst_47 = arith.constant dense<0.000000e+00> : vector<9xf32>
    %75 = vector.multi_reduction <add>, %74, %cst_47 [1] : vector<9x128xf32> to vector<9xf32>
    %76 = vector.shape_cast %75 : vector<9xf32> to vector<9x1xf32>
    %77 = arith.addf %70, %76 : vector<9x1xf32>
    %c8 = arith.constant 8 : index
    %c0_48 = arith.constant 0 : index
    %c0_49 = arith.constant 0 : index
    %c0_50 = arith.constant 0 : index
    %78 = vector.load %arg2[%c8, %c0_48, %c0_49, %c0_50] : memref<10x1x9x128xbf16, #tpu.memory_space<vmem>>, vector<1x1x9x128xbf16>
    %79 = vector.shape_cast %78 : vector<1x1x9x128xbf16> to vector<9x128xbf16>
    %80 = arith.extf %79 : vector<9x128xbf16> to vector<9x128xf32>
    %81 = arith.mulf %80, %22 : vector<9x128xf32>
    %cst_51 = arith.constant dense<0.000000e+00> : vector<9xf32>
    %82 = vector.multi_reduction <add>, %81, %cst_51 [1] : vector<9x128xf32> to vector<9xf32>
    %83 = vector.shape_cast %82 : vector<9xf32> to vector<9x1xf32>
    %84 = arith.addf %77, %83 : vector<9x1xf32>
    %c9 = arith.constant 9 : index
    %c0_52 = arith.constant 0 : index
    %c0_53 = arith.constant 0 : index
    %c0_54 = arith.constant 0 : index
    %85 = vector.load %arg2[%c9, %c0_52, %c0_53, %c0_54] : memref<10x1x9x128xbf16, #tpu.memory_space<vmem>>, vector<1x1x9x128xbf16>
    %86 = vector.shape_cast %85 : vector<1x1x9x128xbf16> to vector<9x128xbf16>
    %87 = arith.extf %86 : vector<9x128xbf16> to vector<9x128xf32>
    %88 = arith.mulf %87, %22 : vector<9x128xf32>
    %cst_55 = arith.constant dense<0.000000e+00> : vector<9xf32>
    %89 = vector.multi_reduction <add>, %88, %cst_55 [1] : vector<9x128xf32> to vector<9xf32>
    %90 = vector.shape_cast %89 : vector<9xf32> to vector<9x1xf32>
    %91 = arith.addf %84, %90 : vector<9x1xf32>
    %92 = tpu.reciprocal %91 {approx = true} : vector<9x1xf32> -> vector<9x1xf32>
    %c0_56 = arith.constant 0 : index
    %c0_57 = arith.constant 0 : index
    %c0_58 = arith.constant 0 : index
    %c0_59 = arith.constant 0 : index
    %93 = vector.load %arg2[%c0_56, %c0_57, %c0_58, %c0_59] : memref<10x1x9x128xbf16, #tpu.memory_space<vmem>>, vector<1x1x9x128xbf16>
    %94 = vector.shape_cast %93 : vector<1x1x9x128xbf16> to vector<9x128xbf16>
    %95 = arith.extf %94 : vector<9x128xbf16> to vector<9x128xf32>
    %96 = arith.mulf %28, %92 : vector<9x1xf32>
    %97 = vector.broadcast %96 : vector<9x1xf32> to vector<9x128xf32>
    %98 = arith.mulf %95, %97 : vector<9x128xf32>
    %c1_60 = arith.constant 1 : index
    %c0_61 = arith.constant 0 : index
    %c0_62 = arith.constant 0 : index
    %c0_63 = arith.constant 0 : index
    %99 = vector.load %arg2[%c1_60, %c0_61, %c0_62, %c0_63] : memref<10x1x9x128xbf16, #tpu.memory_space<vmem>>, vector<1x1x9x128xbf16>
    %100 = vector.shape_cast %99 : vector<1x1x9x128xbf16> to vector<9x128xbf16>
    %101 = arith.extf %100 : vector<9x128xbf16> to vector<9x128xf32>
    %102 = arith.mulf %34, %92 : vector<9x1xf32>
    %103 = vector.broadcast %102 : vector<9x1xf32> to vector<9x128xf32>
    %104 = arith.mulf %101, %103 : vector<9x128xf32>
    %105 = arith.addf %98, %104 : vector<9x128xf32>
    %c2_64 = arith.constant 2 : index
    %c0_65 = arith.constant 0 : index
    %c0_66 = arith.constant 0 : index
    %c0_67 = arith.constant 0 : index
    %106 = vector.load %arg2[%c2_64, %c0_65, %c0_66, %c0_67] : memref<10x1x9x128xbf16, #tpu.memory_space<vmem>>, vector<1x1x9x128xbf16>
    %107 = vector.shape_cast %106 : vector<1x1x9x128xbf16> to vector<9x128xbf16>
    %108 = arith.extf %107 : vector<9x128xbf16> to vector<9x128xf32>
    %109 = arith.mulf %41, %92 : vector<9x1xf32>
    %110 = vector.broadcast %109 : vector<9x1xf32> to vector<9x128xf32>
    %111 = arith.mulf %108, %110 : vector<9x128xf32>
    %112 = arith.addf %105, %111 : vector<9x128xf32>
    %c3_68 = arith.constant 3 : index
    %c0_69 = arith.constant 0 : index
    %c0_70 = arith.constant 0 : index
    %c0_71 = arith.constant 0 : index
    %113 = vector.load %arg2[%c3_68, %c0_69, %c0_70, %c0_71] : memref<10x1x9x128xbf16, #tpu.memory_space<vmem>>, vector<1x1x9x128xbf16>
    %114 = vector.shape_cast %113 : vector<1x1x9x128xbf16> to vector<9x128xbf16>
    %115 = arith.extf %114 : vector<9x128xbf16> to vector<9x128xf32>
    %116 = arith.mulf %48, %92 : vector<9x1xf32>
    %117 = vector.broadcast %116 : vector<9x1xf32> to vector<9x128xf32>
    %118 = arith.mulf %115, %117 : vector<9x128xf32>
    %119 = arith.addf %112, %118 : vector<9x128xf32>
    %c4_72 = arith.constant 4 : index
    %c0_73 = arith.constant 0 : index
    %c0_74 = arith.constant 0 : index
    %c0_75 = arith.constant 0 : index
    %120 = vector.load %arg2[%c4_72, %c0_73, %c0_74, %c0_75] : memref<10x1x9x128xbf16, #tpu.memory_space<vmem>>, vector<1x1x9x128xbf16>
    %121 = vector.shape_cast %120 : vector<1x1x9x128xbf16> to vector<9x128xbf16>
    %122 = arith.extf %121 : vector<9x128xbf16> to vector<9x128xf32>
    %123 = arith.mulf %55, %92 : vector<9x1xf32>
    %124 = vector.broadcast %123 : vector<9x1xf32> to vector<9x128xf32>
    %125 = arith.mulf %122, %124 : vector<9x128xf32>
    %126 = arith.addf %119, %125 : vector<9x128xf32>
    %c5_76 = arith.constant 5 : index
    %c0_77 = arith.constant 0 : index
    %c0_78 = arith.constant 0 : index
    %c0_79 = arith.constant 0 : index
    %127 = vector.load %arg2[%c5_76, %c0_77, %c0_78, %c0_79] : memref<10x1x9x128xbf16, #tpu.memory_space<vmem>>, vector<1x1x9x128xbf16>
    %128 = vector.shape_cast %127 : vector<1x1x9x128xbf16> to vector<9x128xbf16>
    %129 = arith.extf %128 : vector<9x128xbf16> to vector<9x128xf32>
    %130 = arith.mulf %62, %92 : vector<9x1xf32>
    %131 = vector.broadcast %130 : vector<9x1xf32> to vector<9x128xf32>
    %132 = arith.mulf %129, %131 : vector<9x128xf32>
    %133 = arith.addf %126, %132 : vector<9x128xf32>
    %c6_80 = arith.constant 6 : index
    %c0_81 = arith.constant 0 : index
    %c0_82 = arith.constant 0 : index
    %c0_83 = arith.constant 0 : index
    %134 = vector.load %arg2[%c6_80, %c0_81, %c0_82, %c0_83] : memref<10x1x9x128xbf16, #tpu.memory_space<vmem>>, vector<1x1x9x128xbf16>
    %135 = vector.shape_cast %134 : vector<1x1x9x128xbf16> to vector<9x128xbf16>
    %136 = arith.extf %135 : vector<9x128xbf16> to vector<9x128xf32>
    %137 = arith.mulf %69, %92 : vector<9x1xf32>
    %138 = vector.broadcast %137 : vector<9x1xf32> to vector<9x128xf32>
    %139 = arith.mulf %136, %138 : vector<9x128xf32>
    %140 = arith.addf %133, %139 : vector<9x128xf32>
    %c7_84 = arith.constant 7 : index
    %c0_85 = arith.constant 0 : index
    %c0_86 = arith.constant 0 : index
    %c0_87 = arith.constant 0 : index
    %141 = vector.load %arg2[%c7_84, %c0_85, %c0_86, %c0_87] : memref<10x1x9x128xbf16, #tpu.memory_space<vmem>>, vector<1x1x9x128xbf16>
    %142 = vector.shape_cast %141 : vector<1x1x9x128xbf16> to vector<9x128xbf16>
    %143 = arith.extf %142 : vector<9x128xbf16> to vector<9x128xf32>
    %144 = arith.mulf %76, %92 : vector<9x1xf32>
    %145 = vector.broadcast %144 : vector<9x1xf32> to vector<9x128xf32>
    %146 = arith.mulf %143, %145 : vector<9x128xf32>
    %147 = arith.addf %140, %146 : vector<9x128xf32>
    %c8_88 = arith.constant 8 : index
    %c0_89 = arith.constant 0 : index
    %c0_90 = arith.constant 0 : index
    %c0_91 = arith.constant 0 : index
    %148 = vector.load %arg2[%c8_88, %c0_89, %c0_90, %c0_91] : memref<10x1x9x128xbf16, #tpu.memory_space<vmem>>, vector<1x1x9x128xbf16>
    %149 = vector.shape_cast %148 : vector<1x1x9x128xbf16> to vector<9x128xbf16>
    %150 = arith.extf %149 : vector<9x128xbf16> to vector<9x128xf32>
    %151 = arith.mulf %83, %92 : vector<9x1xf32>
    %152 = vector.broadcast %151 : vector<9x1xf32> to vector<9x128xf32>
    %153 = arith.mulf %150, %152 : vector<9x128xf32>
    %154 = arith.addf %147, %153 : vector<9x128xf32>
    %c9_92 = arith.constant 9 : index
    %c0_93 = arith.constant 0 : index
    %c0_94 = arith.constant 0 : index
    %c0_95 = arith.constant 0 : index
    %155 = vector.load %arg2[%c9_92, %c0_93, %c0_94, %c0_95] : memref<10x1x9x128xbf16, #tpu.memory_space<vmem>>, vector<1x1x9x128xbf16>
    %156 = vector.shape_cast %155 : vector<1x1x9x128xbf16> to vector<9x128xbf16>
    %157 = arith.extf %156 : vector<9x128xbf16> to vector<9x128xf32>
    %158 = arith.mulf %90, %92 : vector<9x1xf32>
    %159 = vector.broadcast %158 : vector<9x1xf32> to vector<9x128xf32>
    %160 = arith.mulf %157, %159 : vector<9x128xf32>
    %161 = arith.addf %154, %160 : vector<9x128xf32>
    %162 = tpu.iota {dimensions = array<i32: 1>} : vector<9x128xi32>
    %163 = tpu.iota {dimensions = array<i32: 0>} : vector<9x128xi32>
    %c100_i32 = arith.constant 100 : i32
    %164 = vector.broadcast %c100_i32 : i32 to vector<9x128xi32>
    %165 = arith.cmpi sge, %162, %164 : vector<9x128xi32>
    %cst_96 = arith.constant 0.000000e+00 : f32
    %166 = vector.broadcast %cst_96 : f32 to vector<9x128xf32>
    %167 = arith.select %165, %166, %161 : vector<9x128xi1>, vector<9x128xf32>
    %c8_i32 = arith.constant 8 : i32
    %168 = vector.broadcast %c8_i32 : i32 to vector<9x128xi32>
    %169 = arith.cmpi slt, %163, %168 : vector<9x128xi32>
    %170 = arith.cmpf one, %167, %167 : vector<9x128xf32>
    %171 = arith.andi %169, %170 : vector<9x128xi1>
    %cst_97 = arith.constant 0.000000e+00 : f32
    %172 = vector.broadcast %cst_97 : f32 to vector<9x128xf32>
    %173 = arith.select %171, %172, %167 : vector<9x128xi1>, vector<9x128xf32>
    %174 = arith.truncf %173 : vector<9x128xf32> to vector<9x128xbf16>
    %c0_98 = arith.constant 0 : index
    %c0_99 = arith.constant 0 : index
    %175 = vector.load %arg7[%c0_98, %c0_99] : memref<128x128xbf16, #tpu.memory_space<vmem>>, vector<128x128xbf16>
    %cst_100 = arith.constant dense<0.000000e+00> : vector<9x128xf32>
    %176 = tpu.matmul %174, %175, %cst_100 {dimension_numbers = #tpu.dot_dimension_numbers<[1], [0], [0], [1], [0, 0, 1, 1], [], []>} : vector<9x128xbf16>, vector<128x128xbf16>, vector<9x128xf32> -> vector<9x128xf32>
    %cst_101 = arith.constant 0.000000e+00 : f32
    %177 = vector.broadcast %cst_101 : f32 to vector<9x128xf32>
    %178 = arith.maximumf %176, %177 : vector<9x128xf32>
    %179 = arith.truncf %178 : vector<9x128xf32> to vector<9x128xbf16>
    %c0_102 = arith.constant 0 : index
    %c0_103 = arith.constant 0 : index
    %180 = vector.load %arg8[%c0_102, %c0_103] : memref<128x128xbf16, #tpu.memory_space<vmem>>, vector<128x128xbf16>
    %cst_104 = arith.constant dense<0.000000e+00> : vector<9x128xf32>
    %181 = tpu.matmul %179, %180, %cst_104 {dimension_numbers = #tpu.dot_dimension_numbers<[1], [0], [0], [1], [0, 0, 1, 1], [], []>} : vector<9x128xbf16>, vector<128x128xbf16>, vector<9x128xf32> -> vector<9x128xf32>
    %c0_105 = arith.constant 0 : index
    %c0_106 = arith.constant 0 : index
    %182 = vector.load %arg9[%c0_105, %c0_106] : memref<1x128xf32, #tpu.memory_space<vmem>>, vector<1x128xf32>
    %183 = vector.broadcast %182 : vector<1x128xf32> to vector<9x128xf32>
    %184 = arith.addf %181, %183 : vector<9x128xf32>
    %cst_107 = arith.constant 0.000000e+00 : f32
    %185 = vector.broadcast %cst_107 : f32 to vector<9x128xf32>
    %186 = arith.maximumf %184, %185 : vector<9x128xf32>
    %187 = vector.extract_strided_slice %186 {offsets = [0, 0], sizes = [8, 128], strides = [1, 1]} : vector<9x128xf32> to vector<8x128xf32>
    %188 = vector.broadcast %3 : vector<8x1xf32> to vector<8x128xf32>
    %189 = arith.mulf %187, %188 : vector<8x128xf32>
    %cst_108 = arith.constant dense<0.000000e+00> : vector<128xf32>
    %190 = vector.multi_reduction <add>, %189, %cst_108 [0] : vector<8x128xf32> to vector<128xf32>
    %191 = vector.shape_cast %190 : vector<128xf32> to vector<1x128xf32>
    %192 = vector.extract_strided_slice %186 {offsets = [8, 0], sizes = [1, 128], strides = [1, 1]} : vector<9x128xf32> to vector<1x128xf32>
    %193 = arith.addf %20, %21 : vector<1x128xf32>
    %194 = tpu.concatenate %20, %193 in 0 : vector<1x128xf32>, vector<1x128xf32> -> vector<2x128xf32>
    %195 = arith.truncf %194 : vector<2x128xf32> to vector<2x128xbf16>
    %c0_109 = arith.constant 0 : index
    %c0_110 = arith.constant 0 : index
    %196 = vector.load %arg10[%c0_109, %c0_110] : memref<128x128xbf16, #tpu.memory_space<vmem>>, vector<128x128xbf16>
    %cst_111 = arith.constant dense<0.000000e+00> : vector<2x128xf32>
    %197 = tpu.matmul %195, %196, %cst_111 {dimension_numbers = #tpu.dot_dimension_numbers<[1], [0], [0], [1], [0, 0, 1, 1], [], []>} : vector<2x128xbf16>, vector<128x128xbf16>, vector<2x128xf32> -> vector<2x128xf32>
    %c0_112 = arith.constant 0 : index
    %c0_113 = arith.constant 0 : index
    %198 = vector.load %arg11[%c0_112, %c0_113] : memref<1x128xf32, #tpu.memory_space<vmem>>, vector<1x128xf32>
    %199 = vector.broadcast %198 : vector<1x128xf32> to vector<2x128xf32>
    %200 = arith.addf %197, %199 : vector<2x128xf32>
    %cst_114 = arith.constant 0.000000e+00 : f32
    %201 = vector.broadcast %cst_114 : f32 to vector<2x128xf32>
    %202 = arith.maximumf %200, %201 : vector<2x128xf32>
    %203 = arith.truncf %202 : vector<2x128xf32> to vector<2x128xbf16>
    %c0_115 = arith.constant 0 : index
    %c0_116 = arith.constant 0 : index
    %204 = vector.load %arg12[%c0_115, %c0_116] : memref<128x128xbf16, #tpu.memory_space<vmem>>, vector<128x128xbf16>
    %cst_117 = arith.constant dense<0.000000e+00> : vector<2x128xf32>
    %205 = tpu.matmul %203, %204, %cst_117 {dimension_numbers = #tpu.dot_dimension_numbers<[1], [0], [0], [1], [0, 0, 1, 1], [], []>} : vector<2x128xbf16>, vector<128x128xbf16>, vector<2x128xf32> -> vector<2x128xf32>
    %c0_118 = arith.constant 0 : index
    %c0_119 = arith.constant 0 : index
    %206 = vector.load %arg13[%c0_118, %c0_119] : memref<1x128xf32, #tpu.memory_space<vmem>>, vector<1x128xf32>
    %207 = vector.broadcast %206 : vector<1x128xf32> to vector<2x128xf32>
    %208 = arith.addf %205, %207 : vector<2x128xf32>
    %cst_120 = arith.constant 0.000000e+00 : f32
    %209 = vector.broadcast %cst_120 : f32 to vector<2x128xf32>
    %210 = arith.maximumf %208, %209 : vector<2x128xf32>
    %c0_121 = arith.constant 0 : index
    %c0_122 = arith.constant 0 : index
    %211 = vector.load %arg14[%c0_121, %c0_122] : memref<1x128xf32, #tpu.memory_space<vmem>>, vector<1x128xf32>
    %212 = vector.broadcast %211 : vector<1x128xf32> to vector<2x128xf32>
    %213 = arith.mulf %210, %212 : vector<2x128xf32>
    %cst_123 = arith.constant dense<0.000000e+00> : vector<2xf32>
    %214 = vector.multi_reduction <add>, %213, %cst_123 [1] : vector<2x128xf32> to vector<2xf32>
    %215 = vector.shape_cast %214 : vector<2xf32> to vector<2x1xf32>
    %c0_124 = arith.constant 0 : index
    %c0_125 = arith.constant 0 : index
    %216 = vector.load %arg15[%c0_124, %c0_125] : memref<1x1xf32, #tpu.memory_space<vmem>>, vector<1x1xf32>
    %217 = vector.broadcast %216 : vector<1x1xf32> to vector<2x1xf32>
    %218 = arith.addf %215, %217 : vector<2x1xf32>
    %219 = arith.addf %191, %192 : vector<1x128xf32>
    %220 = tpu.concatenate %191, %219 in 0 : vector<1x128xf32>, vector<1x128xf32> -> vector<2x128xf32>
    %221 = arith.truncf %220 : vector<2x128xf32> to vector<2x128xbf16>
    %c0_126 = arith.constant 0 : index
    %c0_127 = arith.constant 0 : index
    %222 = vector.load %arg16[%c0_126, %c0_127] : memref<128x128xbf16, #tpu.memory_space<vmem>>, vector<128x128xbf16>
    %cst_128 = arith.constant dense<0.000000e+00> : vector<2x128xf32>
    %223 = tpu.matmul %221, %222, %cst_128 {dimension_numbers = #tpu.dot_dimension_numbers<[1], [0], [0], [1], [0, 0, 1, 1], [], []>} : vector<2x128xbf16>, vector<128x128xbf16>, vector<2x128xf32> -> vector<2x128xf32>
    %c0_129 = arith.constant 0 : index
    %c0_130 = arith.constant 0 : index
    %224 = vector.load %arg17[%c0_129, %c0_130] : memref<1x128xf32, #tpu.memory_space<vmem>>, vector<1x128xf32>
    %225 = vector.broadcast %224 : vector<1x128xf32> to vector<2x128xf32>
    %226 = arith.addf %223, %225 : vector<2x128xf32>
    %cst_131 = arith.constant 0.000000e+00 : f32
    %227 = vector.broadcast %cst_131 : f32 to vector<2x128xf32>
    %228 = arith.maximumf %226, %227 : vector<2x128xf32>
    %229 = arith.truncf %228 : vector<2x128xf32> to vector<2x128xbf16>
    %c0_132 = arith.constant 0 : index
    %c0_133 = arith.constant 0 : index
    %230 = vector.load %arg18[%c0_132, %c0_133] : memref<128x128xbf16, #tpu.memory_space<vmem>>, vector<128x128xbf16>
    %cst_134 = arith.constant dense<0.000000e+00> : vector<2x128xf32>
    %231 = tpu.matmul %229, %230, %cst_134 {dimension_numbers = #tpu.dot_dimension_numbers<[1], [0], [0], [1], [0, 0, 1, 1], [], []>} : vector<2x128xbf16>, vector<128x128xbf16>, vector<2x128xf32> -> vector<2x128xf32>
    %c0_135 = arith.constant 0 : index
    %c0_136 = arith.constant 0 : index
    %232 = vector.load %arg19[%c0_135, %c0_136] : memref<1x128xf32, #tpu.memory_space<vmem>>, vector<1x128xf32>
    %233 = vector.broadcast %232 : vector<1x128xf32> to vector<2x128xf32>
    %234 = arith.addf %231, %233 : vector<2x128xf32>
    %cst_137 = arith.constant 0.000000e+00 : f32
    %235 = vector.broadcast %cst_137 : f32 to vector<2x128xf32>
    %236 = arith.maximumf %234, %235 : vector<2x128xf32>
    %c0_138 = arith.constant 0 : index
    %c0_139 = arith.constant 0 : index
    %237 = vector.load %arg20[%c0_138, %c0_139] : memref<1x128xf32, #tpu.memory_space<vmem>>, vector<1x128xf32>
    %238 = vector.broadcast %237 : vector<1x128xf32> to vector<2x128xf32>
    %239 = arith.mulf %236, %238 : vector<2x128xf32>
    %cst_140 = arith.constant dense<0.000000e+00> : vector<2xf32>
    %240 = vector.multi_reduction <add>, %239, %cst_140 [1] : vector<2x128xf32> to vector<2xf32>
    %241 = vector.shape_cast %240 : vector<2xf32> to vector<2x1xf32>
    %c0_141 = arith.constant 0 : index
    %c0_142 = arith.constant 0 : index
    %242 = vector.load %arg21[%c0_141, %c0_142] : memref<1x1xf32, #tpu.memory_space<vmem>>, vector<1x1xf32>
    %243 = vector.broadcast %242 : vector<1x1xf32> to vector<2x1xf32>
    %244 = arith.addf %241, %243 : vector<2x1xf32>
    %245 = vector.extract_strided_slice %218 {offsets = [1, 0], sizes = [1, 1], strides = [1, 1]} : vector<2x1xf32> to vector<1x1xf32>
    %246 = vector.extract_strided_slice %218 {offsets = [0, 0], sizes = [1, 1], strides = [1, 1]} : vector<2x1xf32> to vector<1x1xf32>
    %247 = arith.subf %245, %246 : vector<1x1xf32>
    %cst_143 = arith.constant 0.699999988 : f32
    %248 = vector.broadcast %cst_143 : f32 to vector<1x1xf32>
    %249 = arith.mulf %248, %247 : vector<1x1xf32>
    %250 = vector.extract_strided_slice %244 {offsets = [1, 0], sizes = [1, 1], strides = [1, 1]} : vector<2x1xf32> to vector<1x1xf32>
    %251 = vector.extract_strided_slice %244 {offsets = [0, 0], sizes = [1, 1], strides = [1, 1]} : vector<2x1xf32> to vector<1x1xf32>
    %252 = arith.subf %250, %251 : vector<1x1xf32>
    %cst_144 = arith.constant 3.000000e-01 : f32
    %253 = vector.broadcast %cst_144 : f32 to vector<1x1xf32>
    %254 = arith.mulf %253, %252 : vector<1x1xf32>
    %255 = arith.addf %249, %254 : vector<1x1xf32>
    %cst_145 = arith.constant 1.000000e+00 : f32
    %256 = vector.broadcast %cst_145 : f32 to vector<1x1xf32>
    %257 = arith.mulf %255, %256 : vector<1x1xf32>
    %258 = vector.shape_cast %257 : vector<1x1xf32> to vector<1x1x1xf32>
    %259 = vector.shape_cast %258 : vector<1x1x1xf32> to vector<1x1x1xf32>
    %260 = vector.broadcast %259 : vector<1x1x1xf32> to vector<1x8x128xf32>
    %c0_146 = arith.constant 0 : index
    %c0_147 = arith.constant 0 : index
    %c0_148 = arith.constant 0 : index
    %261 = vector.load %arg22[%c0_146, %c0_147, %c0_148] : memref<1x8x128xf32, #tpu.memory_space<vmem>>, vector<1x8x128xf32>
    tpu.vector_store %arg22[%c0_146, %c0_147, %c0_148], %260 {strides = array<i32>} : memref<1x8x128xf32, #tpu.memory_space<vmem>>, vector<1x8x128xf32>,
    return
  }
  func.func @transform_0(%arg0: i32) -> (i32, i32, i32) {
    %c0_i32 = arith.constant 0 : i32
    %c0_i32_0 = arith.constant 0 : i32
    %c0_i32_1 = arith.constant 0 : i32
    return %arg0, %c0_i32, %c0_i32_0 : i32, i32, i32
  }
  func.func @transform_1(%arg0: i32) -> (i32, i32, i32, i32) {
    %c0_i32 = arith.constant 0 : i32
    %c0_i32_0 = arith.constant 0 : i32
    %c0_i32_1 = arith.constant 0 : i32
    %c0_i32_2 = arith.constant 0 : i32
    return %c0_i32, %arg0, %c0_i32_0, %c0_i32_1 : i32, i32, i32, i32
  }
  func.func @transform_2(%arg0: i32) -> (i32, i32, i32) {
    %c0_i32 = arith.constant 0 : i32
    %c0_i32_0 = arith.constant 0 : i32
    %c0_i32_1 = arith.constant 0 : i32
    return %arg0, %c0_i32, %c0_i32_0 : i32, i32, i32
  }
  func.func @transform_3(%arg0: i32) -> (i32, i32) {
    %c0_i32 = arith.constant 0 : i32
    %c0_i32_0 = arith.constant 0 : i32
    %c0_i32_1 = arith.constant 0 : i32
    return %c0_i32, %c0_i32_0 : i32, i32
  }
  func.func @transform_4(%arg0: i32) -> (i32, i32) {
    %c0_i32 = arith.constant 0 : i32
    %c0_i32_0 = arith.constant 0 : i32
    %c0_i32_1 = arith.constant 0 : i32
    return %c0_i32, %c0_i32_0 : i32, i32
  }
  func.func @transform_5(%arg0: i32) -> (i32, i32) {
    %c0_i32 = arith.constant 0 : i32
    %c0_i32_0 = arith.constant 0 : i32
    %c0_i32_1 = arith.constant 0 : i32
    return %c0_i32, %c0_i32_0 : i32, i32
  }
  func.func @transform_6(%arg0: i32) -> (i32, i32) {
    %c0_i32 = arith.constant 0 : i32
    %c0_i32_0 = arith.constant 0 : i32
    %c0_i32_1 = arith.constant 0 : i32
    return %c0_i32, %c0_i32_0 : i32, i32
  }
  func.func @transform_7(%arg0: i32) -> (i32, i32) {
    %c0_i32 = arith.constant 0 : i32
    %c0_i32_0 = arith.constant 0 : i32
    %c0_i32_1 = arith.constant 0 : i32
    return %c0_i32, %c0_i32_0 : i32, i32
  }
  func.func @transform_8(%arg0: i32) -> (i32, i32) {
    %c0_i32 = arith.constant 0 : i32
    %c0_i32_0 = arith.constant 0 : i32
    %c0_i32_1 = arith.constant 0 : i32
    return %c0_i32, %c0_i32_0 : i32, i32
  }
  func.func @transform_9(%arg0: i32) -> (i32, i32) {
    %c0_i32 = arith.constant 0 : i32
    %c0_i32_0 = arith.constant 0 : i32
    %c0_i32_1 = arith.constant 0 : i32
    return %c0_i32, %c0_i32_0 : i32, i32
  }
  func.func @transform_10(%arg0: i32) -> (i32, i32) {
    %c0_i32 = arith.constant 0 : i32
    %c0_i32_0 = arith.constant 0 : i32
    %c0_i32_1 = arith.constant 0 : i32
    return %c0_i32, %c0_i32_0 : i32, i32
  }
  func.func @transform_11(%arg0: i32) -> (i32, i32) {
    %c0_i32 = arith.constant 0 : i32
    %c0_i32_0 = arith.constant 0 : i32
    %c0_i32_1 = arith.constant 0 : i32
    return %c0_i32, %c0_i32_0 : i32, i32
  }
  func.func @transform_12(%arg0: i32) -> (i32, i32) {
    %c0_i32 = arith.constant 0 : i32
    %c0_i32_0 = arith.constant 0 : i32
    %c0_i32_1 = arith.constant 0 : i32
    return %c0_i32, %c0_i32_0 : i32, i32
  }
  func.func @transform_13(%arg0: i32) -> (i32, i32) {
    %c0_i32 = arith.constant 0 : i32
    %c0_i32_0 = arith.constant 0 : i32
    %c0_i32_1 = arith.constant 0 : i32
    return %c0_i32, %c0_i32_0 : i32, i32
  }
  func.func @transform_14(%arg0: i32) -> (i32, i32) {
    %c0_i32 = arith.constant 0 : i32
    %c0_i32_0 = arith.constant 0 : i32
    %c0_i32_1 = arith.constant 0 : i32
    return %c0_i32, %c0_i32_0 : i32, i32
  }
  func.func @transform_15(%arg0: i32) -> (i32, i32) {
    %c0_i32 = arith.constant 0 : i32
    %c0_i32_0 = arith.constant 0 : i32
    %c0_i32_1 = arith.constant 0 : i32
    return %c0_i32, %c0_i32_0 : i32, i32
  }
  func.func @transform_16(%arg0: i32) -> (i32, i32) {
    %c0_i32 = arith.constant 0 : i32
    %c0_i32_0 = arith.constant 0 : i32
    %c0_i32_1 = arith.constant 0 : i32
    return %c0_i32, %c0_i32_0 : i32, i32
  }
  func.func @transform_17(%arg0: i32) -> (i32, i32) {
    %c0_i32 = arith.constant 0 : i32
    %c0_i32_0 = arith.constant 0 : i32
    %c0_i32_1 = arith.constant 0 : i32
    return %c0_i32, %c0_i32_0 : i32, i32
  }
  func.func @transform_18(%arg0: i32) -> (i32, i32) {
    %c0_i32 = arith.constant 0 : i32
    %c0_i32_0 = arith.constant 0 : i32
    %c0_i32_1 = arith.constant 0 : i32
    return %c0_i32, %c0_i32_0 : i32, i32
  }
  func.func @transform_19(%arg0: i32) -> (i32, i32) {
    %c0_i32 = arith.constant 0 : i32
    %c0_i32_0 = arith.constant 0 : i32
    %c0_i32_1 = arith.constant 0 : i32
    return %c0_i32, %c0_i32_0 : i32, i32
  }
  func.func @transform_20(%arg0: i32) -> (i32, i32) {
    %c0_i32 = arith.constant 0 : i32
    %c0_i32_0 = arith.constant 0 : i32
    %c0_i32_1 = arith.constant 0 : i32
    return %c0_i32, %c0_i32_0 : i32, i32
  }
  func.func @transform_21(%arg0: i32) -> (i32, i32, i32) {
    %c0_i32 = arith.constant 0 : i32
    %c0_i32_0 = arith.constant 0 : i32
    %c0_i32_1 = arith.constant 0 : i32
    return %arg0, %c0_i32, %c0_i32_0 : i32, i32, i32
  }
}

</mosaic_0001>

<bundles_post_ra>
// kernel: cnsyn_forward.1
= control target key start
LH: loop header
LB: loop body
LE: loop exit
PB: predicated region body
PF: predicated region fallthrough
CT: control target
= control target key end

     0   :  { %s2974_s0 = inlined_call_operand.vmem [shape: bf16[2,9,128], index: 0, kind: input, shape index: {}]   ;;  %s2975_s1 = inlined_call_operand.vmem [shape: bf16[10,2,9,128], index: 1, kind: input, shape index: {}]   ;;  %s2976_s2 = inlined_call_operand.vmem [shape: f32[2,8,1], index: 2, kind: input, shape index: {}]   ;;  %s2977_s3 = inlined_call_operand.vmem [shape: bf16[128,128], index: 3, kind: input, shape index: {}]   ;;  %s2978_s4 = inlined_call_operand.vmem [shape: bf16[128,128], index: 4, kind: input, shape index: {}]   ;;  %s2979_s5 = inlined_call_operand.vmem [shape: f32[1,128], index: 5, kind: input, shape index: {}]   ;;  %s2980_s6 = inlined_call_operand.vmem [shape: bf16[128,128], index: 6, kind: input, shape index: {}]   ;;  %s2981_s7 = inlined_call_operand.vmem [shape: bf16[128,128], index: 7, kind: input, shape index: {}]   ;;  %s2982_s8 = inlined_call_operand.vmem [shape: f32[1,128], index: 8, kind: input, shape index: {}]   ;;  %s2983_s9 = inlined_call_operand.vmem [shape: bf16[128,128], index: 9, kind: input, shape index: {}]   ;;  %s2984_s10 = inlined_call_operand.vmem [shape: f32[1,128], index: 10, kind: input, shape index: {}]   ;;  %s2985_s11 = inlined_call_operand.vmem [shape: bf16[128,128], index: 11, kind: input, shape index: {}]   ;;  %s2986_s12 = inlined_call_operand.vmem [shape: f32[1,128], index: 12, kind: input, shape index: {}]   ;;  %s2987_s13 = inlined_call_operand.vmem [shape: f32[1,128], index: 13, kind: input, shape index: {}]   ;;  %s2988_s14 = inlined_call_operand.<no memory space> [shape: f32[1,1], index: 14, kind: input, shape index: {}]   ;;  %s2989_s15 = inlined_call_operand.vmem [shape: bf16[128,128], index: 15, kind: input, shape index: {}]   ;;  %s2990_s16 = inlined_call_operand.vmem [shape: f32[1,128], index: 16, kind: input, shape index: {}]   ;;  %s2991_s17 = inlined_call_operand.vmem [shape: bf16[128,128], index: 17, kind: input, shape index: {}]   ;;  %s2992_s18 = inlined_call_operand.vmem [shape: f32[1,128], index: 18, kind: input, shape index: {}]   ;;  %s2993_s19 = inlined_call_operand.vmem [shape: f32[1,128], index: 19, kind: input, shape index: {}]   ;;  %s2994_s21 = inlined_call_operand.vmem [shape: f32[2,8,128], index: 21, kind: output, shape index: {}]   ;;  %s2995_s20 = inlined_call_operand.<no memory space> [shape: f32[1,1], index: 20, kind: input, shape index: {}]  }
   0x1   :  { %3006 = sst [smem:[#allocation5_spill]] %s2974_s0  ;;  %v26_v0 = vstv %s2988_s14  ;;  %v28_v1 = vstv %s2995_s20 }
   0x2   :  { %3007 = sst [smem:[#allocation6_spill]] %s2975_s1  ;;  %27 = vst [vmem:[#allocation2] sm:$0x1] %v26_v0 }
   0x3   :  { %3008 = sst [smem:[#allocation7_spill]] %s2976_s2  ;;  %29 = vst [vmem:[#allocation3] sm:$0x1] %v28_v1 }
   0x4   :  { %3009 = sst [smem:[#allocation8_spill]] %s2977_s3 }
   0x5   :  { %3010 = sst [smem:[#allocation9_spill]] %s2978_s4 }
   0x6   :  { %3011 = sst [smem:[#allocation10_spill]] %s2979_s5 }
   0x7   :  { %s2409_s3 = smov 0   ;;  %s2411_s28 = smov 0  }
   0x8   :  { %s2413_s29 = smov 0  }
   0x9 LB: > { %s1860_s14 = sadd.s32 4294967295, %s2290_s29   ;;  %s2426_s20 = sadd.s32 1, %s2290_s29   ;;  %s2290_s29 = sphi %s2413_s29, %s3028_s29   ;;  %s2286_s28 = sphi %s2411_s28, %s3027_s28   ;;  %s2282_s3 = sphi %s2409_s3, %s3026_s3  }
   0xa   : > { %s65_s0 = ssub.s32 %s2290_s29, %s2426_s20  ;;  %s68_s4 = sadd.s32 1, %s2286_s28 }
   0xb   : > { %p66_p0 = scmp.eq.s32.totalorder %s65_s0, 0  ;;  %p75_p1 = scmp.ne.s32.totalorder %s2286_s28, %s2282_s3 }
   0xc   : > { %p76_p2 = scmp.eq.s32.totalorder %s2290_s29, 0  ;;  %p1863_p4 = scmp.ge.s32.totalorder %s2290_s29, 2 }
   0xd   : > { %s2435_s30 = scalar_select %p66_p0, %s2286_s28, %s68_s4  }
   0xe   : > { %p77_p3 = por %p76_p2, %p75_p1  ;;  %585 = sbr.rel (%p1863_p4) target bundleno = 39 (0x27), region = 88 }
  0x13   : > { %596 = sbr.rel (!%p77_p3) target bundleno = 39 (0x27), region = 96  ;;  %s598_s5 = sand.u32 (%p77_p3), 1, %s2286_s28  }
  0x14   : > { %s2156_s22 = sshll.u32 (%p77_p3), %s2290_s29, 3  ;;  %s2223_s23 = smul.u32 (%p77_p3), 80, %s598_s5 }
  0x15   : > { %s3012_s2 = sld [smem:[#allocation6_spill]] (%p77_p3) }
  0x16   : > { %s600_s26 = scalar_lea.vmem (%p77_p3), [#allocation4], %s2223_s23 }
  0x1b   : > { %s603_s25 = scalar_lea.vmem %s3012_s2, %s2156_s22 }
  0x1c   : > { %v620_v2 = vld [vmem:[%s603_s25] sm:$0xff]   ;;  %v624_v3 = vld [vmem:[%s603_s25 + $0x10] sm:$0xff]  }
  0x1d   : > { %v628_v4 = vld [vmem:[%s603_s25 + $0x20] sm:$0xff]   ;;  %621 = vst [vmem:[%s600_s26] sm:$0xff] %v620_v2   ;;  %v632_v5 = vld [vmem:[%s603_s25 + $0x30] sm:$0xff]  }
  0x1e   : > { %625 = vst [vmem:[%s600_s26 + $0x8] sm:$0xff] %v624_v3   ;;  %v636_v6 = vld [vmem:[%s603_s25 + $0x40] sm:$0xff]   ;;  %v640_v7 = vld [vmem:[%s603_s25 + $0x50] sm:$0xff]  }
  0x1f   : > { %629 = vst [vmem:[%s600_s26 + $0x10] sm:$0xff] %v628_v4   ;;  %v644_v8 = vld [vmem:[%s603_s25 + $0x60] sm:$0xff]   ;;  %v648_v9 = vld [vmem:[%s603_s25 + $0x70] sm:$0xff]  }
  0x20   : > { %633 = vst [vmem:[%s600_s26 + $0x18] sm:$0xff] %v632_v5   ;;  %v652_v10 = vld [vmem:[%s603_s25 + $0x80] sm:$0xff]   ;;  %v656_v11 = vld [vmem:[%s603_s25 + $0x90] sm:$0xff]  }
  0x21   : > { %637 = vst [vmem:[%s600_s26 + $0x20] sm:$0xff] %v636_v6  }
  0x22   : > { %641 = vst [vmem:[%s600_s26 + $0x28] sm:$0xff] %v640_v7  }
  0x23   : > { %645 = vst [vmem:[%s600_s26 + $0x30] sm:$0xff] %v644_v8  }
  0x24   : > { %649 = vst [vmem:[%s600_s26 + $0x38] sm:$0xff] %v648_v9  }
  0x25   : > { %653 = vst [vmem:[%s600_s26 + $0x40] sm:$0xff] %v652_v10  }
  0x26   : > { %657 = vst [vmem:[%s600_s26 + $0x48] sm:$0xff] %v656_v11  }
  0x27 PF: > { %p1866_p5 = scmp.ge.s32.totalorder %s2290_s29, 1  ;;  %p729_p6 = scmp.lt.s32.totalorder %s2290_s29, 3 }
  0x29   : > { %p730_p7 = pnand %p1866_p5, %p729_p6 }
  0x2a   : > { %s736_s27 = sand.u32 (!%p730_p7), 1, %s2282_s3   ;;  %p803_p8 = scmp.lt.s32.totalorder (!%p730_p7), %s1860_s14, 1 }
  0x2b   : > { %733 = sbr.rel (%p730_p7) target bundleno = 1013 (0x3f5), region = 141  ;;  %s3013_s23 = sld [smem:[#allocation5_spill]] (!%p730_p7) }
  0x2c   : > { %s2224_s0 = smul.u32 (!%p730_p7), 80, %s736_s27  ;;  %s3014_s24 = sld [smem:[#allocation8_spill]] (!%p730_p7) }
  0x2d   : > { %s3015_s1 = sld [smem:[#allocation9_spill]] (!%p730_p7) }
  0x2e   : > { %s2452_s5 = scalar_lea.vmem (!%p730_p7), [#allocation4], %s2224_s0  ;;  %s3025_s22 = sld [smem:[#allocation10_spill]] (!%p730_p7) }
  0x30   : > { %s3030_s14 = smov (!%p803_p8, %s1860_s14), 1  ;;  %v2455_v12 = vld [vmem:[%s2452_s5] sm:$0xf]  ;;  %v2458_v13 = vld [vmem:[%s2452_s5 + $0x4] sm:$0x1]  ;;  %vm1012_vm0 = vcmask 1040384  }
  0x31   : > { %s2450_s4 = sshll.u32 %s3030_s14, 3  ;;  %v1006_v14 = vunpack.c.l.bf16 %v2455_v12  ;;  %v1007_v15 = vunpack.c.l.bf16 %v2458_v13  ;;  %v2469_v16 = vld [vmem:[%s2452_s5 + $0x10] sm:$0xf]  ;;  %v2472_v17 = vld [vmem:[%s2452_s5 + $0xc] sm:$0x1]  ;;  %s3024_s14 = sld [smem:[#allocation7_spill]] }
  0x32   : > { %s2464_s29 = scalar_lea.vmem %s3013_s23, %s2450_s4  ;;  %v1033_v20 = vunpack.c.l.bf16 %v2469_v16  ;;  %v2478_v21 = vld [vmem:[%s2452_s5 + $0x14] sm:$0x1]  ;;  %v2485_v24 = vld [vmem:[%s2452_s5 + $0x8] sm:$0xf]  ;;  %v1020_v29 = vunpack.c.l.bf16 %v2472_v17  ;;  %v2507_v34 = vld [vmem:[%s2452_s5 + $0x1c] sm:$0x1]  ;;  %s815_s3 = scalar_lea.vmem %s2994_s21, %s2450_s4 }
  0x33   : > { %v816_v18 = vld [vmem:[%s2464_s29] sm:$0xf]  ;;  %v817_v19 = vld [vmem:[%s2464_s29 + $0x4] sm:$0x1]  ;;  %v1034_v25 = vunpack.c.l.bf16 %v2478_v21  ;;  %v1019_v31 = vunpack.c.l.bf16 %v2485_v24  ;;  %v2514_v37 = vld [vmem:[%s2452_s5 + $0x18] sm:$0xf]  ;;  %v1048_v40 = vunpack.c.l.bf16 %v2507_v34 }
  0x34   : > { %v2480_v22 = vunpack.c.l.bf16 %v816_v18  ;;  %v2482_v23 = vunpack.c.l.bf16 %v817_v19  ;;  %v2517_v38 = vld [vmem:[%s2452_s5 + $0x20] sm:$0xf]  ;;  %v1047_v41 = vunpack.c.l.bf16 %v2514_v37  ;;  %v2527_v44 = vld [vmem:[%s2452_s5 + $0x24] sm:$0x1]  ;;  %v2530_v45 = vld [vmem:[%s2452_s5 + $0x2c] sm:$0x1] }
  0x35   : > { %v1061_v42 = vunpack.c.l.bf16 %v2517_v38  ;;  %v1062_v48 = vunpack.c.l.bf16 %v2527_v44  ;;  %v3004_v49 = vunpack.c.l.bf16 %v2530_v45  ;;  %v2542_v51 = vld [vmem:[%s2452_s5 + $0x28] sm:$0xf]  ;;  %v2552_v55 = vld [vmem:[%s2452_s5 + $0x34] sm:$0x1]  ;;  %v2560_v59 = vld [vmem:[%s2452_s5 + $0x30] sm:$0xf] }
  0x36   : > { %v1008_v26 = vmul.f32 %v1006_v14, %v2480_v22  ;;  %v1009_v27 = vmul.f32 %v1007_v15, %v2482_v23  ;;  %v1035_v28 = vmul.f32 %v1033_v20, %v2480_v22  ;;  %v1036_v32 = vmul.f32 %v1034_v25, %v2482_v23  ;;  %v2563_v60 = vld [vmem:[%s2452_s5 + $0x38] sm:$0xf]  ;;  %v2572_v1 = vld [vmem:[%s2452_s5 + $0x3c] sm:$0x1]  ;;  %v2575_v2 = vld [vmem:[%s2452_s5 + $0x44] sm:$0x1] }
  0x37   : > { %v1022_v33 = vmul.f32 %v1020_v29, %v2482_v23  ;;  %v1021_v35 = vmul.f32 %v1019_v31, %v2480_v22  ;;  %v1050_v43 = vmul.f32 %v1048_v40, %v2482_v23  ;;  %v1049_v46 = vmul.f32 %v1047_v41, %v2480_v22  ;;  %v2587_v8 = vld [vmem:[%s2452_s5 + $0x40] sm:$0xf]  ;;  %v2597_v18 = vld [vmem:[%s2452_s5 + $0x4c] sm:$0x1]  ;;  %s811_s2 = scalar_lea.vmem %s3024_s14, %s2450_s4 }
  0x38   : > { %1010 = vadd.xlane.f32.xlu0 %v1008_v26  ;;  %v1013_v30 = vsel %vm1012_vm0, %v1009_v27, 0.0  ;;  %1037 = vadd.xlane.f32.xlu2 %v1035_v28  ;;  %v1039_v36 = vsel %vm1012_vm0, %v1036_v32, 0.0  ;;  %v1063_v47 = vmul.f32 %v1061_v42, %v2480_v22  ;;  %v1064_v52 = vmul.f32 %v1062_v48, %v2482_v23  ;;  %v2605_v28 = vld [vmem:[%s2452_s5 + $0x48] sm:$0xf] }
  0x39   : > { %1014 = vadd.xlane.f32.xlu1 %v1013_v30  ;;  %v1025_v39 = vsel %vm1012_vm0, %v1022_v33, 0.0  ;;  %v1053_v50 = vsel %vm1012_vm0, %v1050_v43, 0.0  ;;  %v1075_v53 = vunpack.c.l.bf16 %v2542_v51  ;;  %v1078_v54 = vmul.f32 %v3004_v49, %v2482_v23  ;;  %v2170_v21 = vld [vmem:[%s3015_s1 + $0x18] sm:$0xff] }
  0x3a   : > { %v1067_v56 = vsel %vm1012_vm0, %v1064_v52, 0.0  ;;  %v3002_v61 = vunpack.c.l.bf16 %v2552_v55  ;;  %v1089_v62 = vunpack.c.l.bf16 %v2560_v59  ;;  %v3005_v63 = vunpack.c.l.bf16 %v2563_v60 }
  0x3b   : > { %v1077_v57 = vmul.f32 %v1075_v53, %v2480_v22  ;;  %v1081_v58 = vsel %vm1012_vm0, %v1078_v54, 0.0  ;;  %v3000_v5 = vunpack.c.l.bf16 %v2572_v1  ;;  %v2999_v6 = vunpack.c.l.bf16 %v2575_v2 }
  0x3c   : > { %v1092_v0 = vmul.f32 %v3002_v61, %v2482_v23  ;;  %v1091_v3 = vmul.f32 %v1089_v62, %v2480_v22  ;;  %v1105_v4 = vmul.f32 %v3005_v63, %v2480_v22  ;;  %v3003_v10 = vunpack.c.l.bf16 %v2587_v8  ;;  %v2158_v61 = vld [vmem:[%s2464_s29] sm:$0x10] }
  0x3d   : > { %v1106_v9 = vmul.f32 %v3000_v5, %v2482_v23  ;;  %v1120_v11 = vmul.f32 %v2999_v6, %v2482_v23  ;;  %v2998_v30 = vunpack.c.l.bf16 %v2597_v18  ;;  %v3001_v32 = vunpack.c.l.bf16 %v2605_v28 }
  0x3e   : > { %v1095_v7 = vsel %vm1012_vm0, %v1092_v0, 0.0  ;;  %v1119_v26 = vmul.f32 %v3003_v10, %v2480_v22  ;;  %v3018_v44 = vunpack.c.l.bf16 %v2587_v8  ;;  %vm1567_vm6 = vcmask 1041408  }
  0x3f   : > { %v1109_v19 = vsel %vm1012_vm0, %v1106_v9, 0.0  ;;  %v1123_v27 = vsel %vm1012_vm0, %v1120_v11, 0.0  ;;  %v1134_v33 = vmul.f32 %v2998_v30, %v2482_v23  ;;  %v2164_v11 = vld [vmem:[%s3014_s24 + $0x28] sm:$0xff] }
  0x40   : > { %1023 = vadd.xlane.f32.xlu0 %v1021_v35  ;;  %1040 = vadd.xlane.f32.xlu2 %v1039_v36  ;;  %v1133_v35 = vmul.f32 %v3001_v32, %v2480_v22  ;;  %v2166_v22 = vld [vmem:[%s3014_s24 + $0x38] sm:$0xff] }
  0x41   : > { %1026 = vadd.xlane.f32.xlu1 %v1025_v39  ;;  %v1137_v36 = vsel %vm1012_vm0, %v1134_v33, 0.0  ;;  %889 = vmatpush.bf16.msra.mxu0 %v2166_v22  ;;  %v2163_v22 = vld [vmem:[%s3014_s24 + $0x20] sm:$0xff] }
  0x48   : > { %1051 = vadd.xlane.f32.xlu0 %v1049_v46  ;;  %1065 = vadd.xlane.f32.xlu2 %v1063_v47 }
  0x49   : > { %1054 = vadd.xlane.f32.xlu1 %v1053_v50 }
  0x50   : > { %1068 = vadd.xlane.f32.xlu0 %v1067_v56  ;;  %1082 = vadd.xlane.f32.xlu2 %v1081_v58 }
  0x51   : > { %1079 = vadd.xlane.f32.xlu1 %v1077_v57 }
  0x58   : > { %1093 = vadd.xlane.f32.xlu0 %v1091_v3  ;;  %1107 = vadd.xlane.f32.xlu2 %v1105_v4  ;;  %v2165_v3 = vld [vmem:[%s3014_s24 + $0x30] sm:$0xff] }
  0x59   : > { %1096 = vadd.xlane.f32.xlu1 %v1095_v7  ;;  %890 = vmatpush.bf16.msra.mxu0 %v2165_v3  ;;  %v2182_v7 = vld [vmem:[%s2980_s6 + $0x38] sm:$0xff] }
  0x5a   : > { %1283 = vmatpush.bf16.msra.mxu2 %v2182_v7  ;;  %v2180_v7 = vld [vmem:[%s2980_s6 + $0x28] sm:$0xff] }
  0x5d   : > { %891 = vmatpush.bf16.msra.mxu0 %v2164_v11 }
  0x60   : > { %1110 = vadd.xlane.f32.xlu0 %v1109_v19  ;;  %1124 = vadd.xlane.f32.xlu2 %v1123_v27 }
  0x61   : > { %1121 = vadd.xlane.f32.xlu1 %v1119_v26  ;;  %v2181_v26 = vld [vmem:[%s2980_s6 + $0x30] sm:$0xff]  ;;  %892 = vmatpush.bf16.msra.mxu0 %v2163_v22 }
  0x62   : > { %1284 = vmatpush.bf16.msra.mxu2 %v2181_v26 }
  0x66   : > { %1285 = vmatpush.bf16.msra.mxu2 %v2180_v7 }
  0x68   : > { %1135 = vadd.xlane.f32.xlu0 %v1133_v35 }
  0x69   : > { %1138 = vadd.xlane.f32.xlu1 %v1137_v36 }
  0xab   : > { %v2616_v39 = vpop.xlane.xlu0 %1010  ;;  %v2618_v43 = vpop.xlane.xlu2 %1037 }
  0xac   : > { %v2620_v46 = vpop.xlane.xlu1 %1014 }
  0xb3   : > { %v2622_v47 = vpop.xlane.xlu0 %1023  ;;  %v2624_v50 = vpop.xlane.xlu2 %1040 }
  0xb4   : > { %v2626_v52 = vpop.xlane.xlu1 %1026  ;;  %v1028_v4 = vadd.f32 %v2622_v47, %v2616_v39 }
  0xb5   : > { %v1029_v9 = vadd.f32 %v2626_v52, %v2620_v46 }
  0xb6   : > { %v1042_v19 = vadd.f32 %v2618_v43, %v1028_v4 }
  0xb7   : > { %v1043_v27 = vadd.f32 %v2624_v50, %v1029_v9 }
  0xbb   : > { %v2631_v23 = vpop.xlane.xlu0 %1051  ;;  %v2633_v54 = vpop.xlane.xlu2 %1065 }
  0xbc   : > { %v2635_v56 = vpop.xlane.xlu1 %1054  ;;  %v1056_v35 = vadd.f32 %v2631_v23, %v1042_v19  ;;  %v2162_v19 = vld [vmem:[%s3014_s24 + $0x18] sm:$0xff] }
  0xbd   : > { %v1057_v3 = vadd.f32 %v2635_v56, %v1043_v27  ;;  %893 = vmatpush.bf16.msra.mxu0 %v2162_v19  ;;  %v2179_v27 = vld [vmem:[%s2980_s6 + $0x20] sm:$0xff] }
  0xbe   : > { %v1070_v11 = vadd.f32 %v2633_v54, %v1056_v35  ;;  %1286 = vmatpush.bf16.msra.mxu2 %v2179_v27  ;;  %v2161_v35 = vld [vmem:[%s3014_s24 + $0x10] sm:$0xff] }
  0xc1   : > { %894 = vmatpush.bf16.msra.mxu0 %v2161_v35 }
  0xc3   : > { %v2637_v57 = vpop.xlane.xlu0 %1068  ;;  %v2641_v0 = vpop.xlane.xlu2 %1082 }
  0xc4   : > { %v2639_v58 = vpop.xlane.xlu1 %1079  ;;  %v1071_v9 = vadd.f32 %v2637_v57, %v1057_v3 }
  0xc5   : > { %v1084_v26 = vadd.f32 %v2639_v58, %v1070_v11  ;;  %v2178_v11 = vld [vmem:[%s2980_s6 + $0x18] sm:$0xff] }
  0xc6   : > { %v1085_v22 = vadd.f32 %v2641_v0, %v1071_v9  ;;  %1287 = vmatpush.bf16.msra.mxu2 %v2178_v11  ;;  %v2159_v11 = vld [vmem:[%s3014_s24] sm:$0xff] }
  0xcb   : > { %v2661_v33 = vpop.xlane.xlu0 %1093  ;;  %v2670_v4 = vpop.xlane.xlu2 %1107 }
  0xcc   : > { %v2664_v36 = vpop.xlane.xlu1 %1096  ;;  %v1098_v3 = vadd.f32 %v2661_v33, %v1084_v26  ;;  %v2160_v26 = vld [vmem:[%s3014_s24 + $0x8] sm:$0xff] }
  0xcd   : > { %v1099_v7 = vadd.f32 %v2664_v36, %v1085_v22  ;;  %895 = vmatpush.bf16.msra.mxu0 %v2160_v26  ;;  %v2177_v22 = vld [vmem:[%s2980_s6 + $0x10] sm:$0xff]  ;;  %v2176_v26 = vld [vmem:[%s2980_s6 + $0x8] sm:$0xff] }
  0xce   : > { %v1112_v19 = vadd.f32 %v2670_v4, %v1098_v3  ;;  %1288 = vmatpush.bf16.msra.mxu2 %v2177_v22  ;;  %v2174_v22 = vld [vmem:[%s3015_s1 + $0x38] sm:$0xff] }
  0xcf   : > { %974 = vmatpush.bf16.msra.mxu1 %v2174_v22 }
  0xd1   : > { %896 = vmatpush.bf16.msra.mxu0 %v2159_v11 }
  0xd2   : > { %1289 = vmatpush.bf16.msra.mxu2 %v2176_v26  ;;  %v2189_v26 = vld [vmem:[%s2981_s7 + $0x30] sm:$0xff] }
  0xd3   : > { %v2685_v30 = vpop.xlane.xlu0 %1110  ;;  %v2699_v5 = vpop.xlane.xlu2 %1124 }
  0xd4   : > { %v2688_v6 = vpop.xlane.xlu1 %1121  ;;  %v1113_v9 = vadd.f32 %v2685_v30, %v1099_v7 }
  0xd5   : > { %v1126_v27 = vadd.f32 %v2688_v6, %v1112_v19 }
  0xd6   : > { %v1127_v35 = vadd.f32 %v2699_v5, %v1113_v9  ;;  %v1873_v9 = vld [vmem:[%s2464_s29] sm:$0xf] }
  0xd7   : > { %v1874_v10 = vor.u32 %v2158_v61, %v1873_v9  ;;  %v2173_v61 = vld [vmem:[%s3015_s1 + $0x30] sm:$0xff] }
  0xd8   : > { %975 = vmatpush.bf16.msra.mxu1 %v2173_v61 }
  0xd9   : > { %897 = vmatmul.bf16.vlgmr.msra.gmra.mxu0 %v1874_v10 }
  0xdb   : > { %v2709_v7 = vpop.xlane.xlu0 %1135 }
  0xdc   : > { %v1140_v3 = vadd.f32 %v2709_v7, %v1126_v27  ;;  %v2712_v32 = vpop.xlane.xlu1 %1138  ;;  %v2175_v27 = vld [vmem:[%s2980_s6] sm:$0xff] }
  0xdd   : > { %v1141_v19 = vadd.f32 %v2712_v32, %v1127_v35  ;;  %v2190_v35 = vld [vmem:[%s2981_s7 + $0x38] sm:$0xff]  ;;  %1290 = vmatpush.bf16.msra.mxu2 %v2175_v27 }
  0xde   : > { %2264 = vrcp.f32 %v1140_v3  ;;  %1368 = vmatpush.bf16.msra.mxu3 %v2190_v35 }
  0xdf   : > { %2266 = vrcp.f32 %v1141_v19 }
  0xe2   : > { %1369 = vmatpush.bf16.msra.mxu3 %v2189_v26 }
  0xe4   : > { %v2265_v3 = vpop.eup %2264 }
  0xe5   : > { %v1144_v11 = vmul.f32 %v2265_v3, %v2616_v39  ;;  %v1148_v19 = vmul.f32 %v2265_v3, %v2622_v47  ;;  %v1154_v10 = vmul.f32 %v2265_v3, %v2618_v43  ;;  %v2267_v9 = vpop.eup %2266  ;;  %v1160_v49 = vmul.f32 %v2265_v3, %v2631_v23  ;;  %v2172_v39 = vld [vmem:[%s3015_s1 + $0x28] sm:$0xff] }
  0xe6   : > { %v1166_v35 = vmul.f32 %v2265_v3, %v2633_v54  ;;  %v1145_v63 = vmul.f32 %v2267_v9, %v2620_v46  ;;  %v1149_v12 = vmul.f32 %v2267_v9, %v2626_v52  ;;  %v1172_v23 = vmul.f32 %v2265_v3, %v2639_v58  ;;  %976 = vmatpush.bf16.msra.mxu1 %v2172_v39  ;;  %v2171_v46 = vld [vmem:[%s3015_s1 + $0x20] sm:$0xff] }
  0xe7   : > { %v1146_v27 = vmul.f32 %v1144_v11, %v1006_v14  ;;  %v1150_v22 = vmul.f32 %v1148_v19, %v1019_v31  ;;  %v1156_v47 = vmul.f32 %v1154_v10, %v1033_v20  ;;  %v1155_v14 = vmul.f32 %v2267_v9, %v2624_v50 }
  0xe8   : > { %v1162_v31 = vmul.f32 %v1160_v49, %v1047_v41  ;;  %v1147_v61 = vmul.f32 %v1145_v63, %v1007_v15  ;;  %v1151_v16 = vmul.f32 %v1149_v12, %v1020_v29  ;;  %v1161_v20 = vmul.f32 %v2267_v9, %v2635_v56 }
  0xe9   : > { %v1152_v43 = vadd.f32 %v1150_v22, %v1146_v27  ;;  %v1168_v37 = vmul.f32 %v1166_v35, %v1061_v42  ;;  %v1178_v41 = vmul.f32 %v2265_v3, %v2661_v33  ;;  %v1157_v13 = vmul.f32 %v1155_v14, %v1034_v25 }
  0xea   : > { %v1153_v49 = vadd.f32 %v1151_v16, %v1147_v61  ;;  %v1167_v15 = vmul.f32 %v2267_v9, %v2637_v57  ;;  %v1174_v29 = vmul.f32 %v1172_v23, %v1075_v53  ;;  %v1184_v63 = vmul.f32 %v2265_v3, %v2670_v4  ;;  %977 = vmatpush.bf16.msra.mxu1 %v2171_v46 }
  0xeb   : > { %v1158_v24 = vadd.f32 %v1156_v47, %v1152_v43  ;;  %v1163_v54 = vmul.f32 %v1161_v20, %v1048_v40  ;;  %v1173_v38 = vmul.f32 %v2267_v9, %v2641_v0  ;;  %v1202_v42 = vlaneseq  ;;  %v2185_v20 = vld [vmem:[%s2981_s7 + $0x10] sm:$0xff] }
  0xec   : > { %v1159_v52 = vadd.f32 %v1157_v13, %v1153_v49  ;;  %v1180_v56 = vmul.f32 %v1178_v41, %v1089_v62  ;;  %v1190_v51 = vmul.f32 %v2265_v3, %v2688_v6  ;;  %v1169_v57 = vmul.f32 %v1167_v15, %v1062_v48  ;;  %v2183_v41 = vld [vmem:[%s2981_s7] sm:$0xff]  ;;  %v2198_v13 = vld [vmem:[%s2983_s9 + $0x38] sm:$0xff] }
  0xed   : > { %v1164_v50 = vadd.f32 %v1162_v31, %v1158_v24  ;;  %v1179_v34 = vmul.f32 %v2267_v9, %v2664_v36  ;;  %v3016_v58 = vunpack.c.l.bf16 %v2563_v60  ;;  %v1196_v33 = vmul.f32 %v2265_v3, %v2709_v7  ;;  %v2167_v24 = vld [vmem:[%s3015_s1] sm:$0xff]  ;;  %v2186_v31 = vld [vmem:[%s2981_s7 + $0x18] sm:$0xff]  ;;  %1465 = vmatpush.bf16.msrb.mxu0 %v2198_v13 }
  0xee   : > { %v1165_v53 = vadd.f32 %v1163_v54, %v1159_v52  ;;  %v3017_v11 = vunpack.c.l.bf16 %v2530_v45  ;;  %v1185_v59 = vmul.f32 %v2267_v9, %v2685_v30  ;;  %v1203_v62 = vand.u32 127, %v1202_v42  ;;  %978 = vmatpush.bf16.msra.mxu1 %v2170_v21  ;;  %v818_v49 = vld [vmem:[%s811_s2] sm:$0xff]  ;;  %v2196_v42 = vld [vmem:[%s2983_s9 + $0x28] sm:$0xff] }
  0xef   : > { %v1170_v17 = vadd.f32 %v1168_v37, %v1164_v50  ;;  %v1186_v0 = vmul.f32 %v1184_v63, %v3016_v58  ;;  %v1192_v48 = vmul.f32 %v1190_v51, %v3018_v44  ;;  %v3019_v36 = vunpack.c.l.bf16 %v2552_v55  ;;  %v2184_v50 = vld [vmem:[%s2981_s7 + $0x8] sm:$0xff]  ;;  %v2195_v21 = vld [vmem:[%s2983_s9 + $0x20] sm:$0xff]  ;;  %v2193_v51 = vld [vmem:[%s2983_s9 + $0x10] sm:$0xff] }
  0xf0   : > { %v1171_v4 = vadd.f32 %v1169_v57, %v1165_v53  ;;  %v1175_v19 = vmul.f32 %v1173_v38, %v3017_v11  ;;  %v1191_v60 = vmul.f32 %v2267_v9, %v2699_v5  ;;  %v3020_v7 = vunpack.c.l.bf16 %v2605_v28  ;;  %v2213_v53 = vld [vmem:[%s2989_s15 + $0x30] sm:$0xff]  ;;  %v2254_v57 = vld [vmem:[%s3025_s22] ss:$0 sm:$0xff] }
  0xf1   : > { %v1176_v25 = vadd.f32 %v1174_v29, %v1170_v17  ;;  %v1181_v26 = vmul.f32 %v1179_v34, %v3019_v36  ;;  %v3021_v22 = vunpack.c.l.bf16 %v2572_v1  ;;  %v1197_v39 = vmul.f32 %v2267_v9, %v2712_v32  ;;  %v2169_v32 = vld [vmem:[%s3015_s1 + $0x10] sm:$0xff]  ;;  %v2187_v9 = vld [vmem:[%s2981_s7 + $0x20] sm:$0xff]  ;;  %v2192_v36 = vld [vmem:[%s2983_s9 + $0x8] sm:$0xff] }
  0xf2   : > { %v1177_v10 = vadd.f32 %v1175_v19, %v1171_v4  ;;  %v1198_v3 = vmul.f32 %v1196_v33, %v3020_v7  ;;  %vm1207_vm1 = vcmp.ge.s32.totalorder %v1203_v62, 100  ;;  %v3022_v47 = vunpack.c.l.bf16 %v2575_v2  ;;  %v2188_v2 = vld [vmem:[%s2981_s7 + $0x28] sm:$0xff]  ;;  %979 = vmatpush.bf16.msra.mxu1 %v2169_v32  ;;  %v2197_v17 = vld [vmem:[%s2983_s9 + $0x30] sm:$0xff]  ;;  %v2191_v7 = vld [vmem:[%s2983_s9] sm:$0xff] }
  0xf3   : > { %v1182_v40 = vadd.f32 %v1180_v56, %v1176_v25  ;;  %v1187_v30 = vmul.f32 %v1185_v59, %v3021_v22  ;;  %v3023_v5 = vunpack.c.l.bf16 %v2597_v18  ;;  %vm1989_vm3 = vmneg %vm1207_vm1  ;;  %1370 = vmatpush.bf16.msra.mxu3 %v2188_v2  ;;  %v2168_v18 = vld [vmem:[%s3015_s1 + $0x8] sm:$0xff]  ;;  %v2292_v15 = vmov 0   ;;  %1466 = vmatpush.bf16.msrb.mxu0 %v2197_v17  ;;  %v2214_v25 = vld [vmem:[%s2989_s15 + $0x38] sm:$0xff] }
  0xf4   : > { %v1183_v45 = vadd.f32 %v1181_v26, %v1177_v10  ;;  %v1193_v35 = vmul.f32 %v1191_v60, %v3022_v47  ;;  %2252 = vset.pattern.permute.xlu2 %v2292_v15  ;;  %2253 = vset.pattern.permute.xlu0 %v2292_v15  ;;  %v2194_v56 = vld [vmem:[%s2983_s9 + $0x18] sm:$0xff]  ;;  %v2212_v60 = vld [vmem:[%s2989_s15 + $0x28] sm:$0xff] }
  0xf5   : > { %v1188_v6 = vadd.f32 %v1186_v0, %v1182_v40  ;;  %v1199_v14 = vmul.f32 %v1197_v39, %v3023_v5  ;;  %992 = vperm.xlu2 %2252, %v818_v49   ;;  %1650 = vmatpush.bf16.msrb.mxu2 %v2214_v25  ;;  %v2209_v39 = vld [vmem:[%s2989_s15 + $0x10] sm:$0xff]  ;;  %v2206_v47 = vld [vmem:[%s2985_s11 + $0x38] sm:$0xff]  ;;  %v2204_v5 = vld [vmem:[%s2985_s11 + $0x28] sm:$0xff] }
  0xf6   : > { %v1189_v8 = vadd.f32 %v1187_v30, %v1183_v45  ;;  %980 = vmatpush.bf16.msra.mxu1 %v2168_v18  ;;  %v2210_v30 = vld [vmem:[%s2989_s15 + $0x18] sm:$0xff]  ;;  %v2200_v15 = vld [vmem:[%s2985_s11 + $0x8] sm:$0xff] }
  0xf7   : > { %v1194_v27 = vadd.f32 %v1192_v48, %v1188_v6  ;;  %1371 = vmatpush.bf16.msra.mxu3 %v2187_v9  ;;  %1467 = vmatpush.bf16.msrb.mxu0 %v2196_v42  ;;  %v2202_v18 = vld [vmem:[%s2985_s11 + $0x18] sm:$0xff]  ;;  %v2217_v42 = vld [vmem:[%s2991_s17 + $0x10] sm:$0xff] }
  0xf8   : > { %v1195_v12 = vadd.f32 %v1193_v35, %v1189_v8  ;;  %v2207_v8 = vld [vmem:[%s2989_s15] sm:$0xff]  ;;  %v2205_v35 = vld [vmem:[%s2985_s11 + $0x30] sm:$0xff]  ;;  %v2222_v17 = vld [vmem:[%s2991_s17 + $0x38] sm:$0xff] }
  0xf9   : > { %v1200_v43 = vadd.f32 %v1198_v3, %v1194_v27  ;;  %1651 = vmatpush.bf16.msrb.mxu2 %v2213_v53  ;;  %v2211_v3 = vld [vmem:[%s2989_s15 + $0x20] sm:$0xff] }
  0xfa   : > { %v1201_v28 = vadd.f32 %v1199_v14, %v1195_v12  ;;  %981 = vmatpush.bf16.msra.mxu1 %v2167_v24 }
  0xfb   : > { %v1208_v55 = vsel %vm1207_vm1, 0.0, %v1200_v43  ;;  %1372 = vmatpush.bf16.msra.mxu3 %v2186_v31  ;;  %1468 = vmatpush.bf16.msrb.mxu0 %v2195_v21  ;;  %v2208_v43 = vld [vmem:[%s2989_s15 + $0x8] sm:$0xff]  ;;  %v2256_v21 = vld [vmem:[%s2984_s10] ss:$0 sm:$0xff] }
  0xfc   : > { %vm1212_vm2 = vcmp.ne.f32.partialorder %v1208_v55, %v1208_v55  ;;  %v1992_v1 = vpack.c.bf16 %v1201_v28, %v1208_v55  ;;  %v2255_v55 = vld [vmem:[%s2982_s8] ss:$0 sm:$0xff] }
  0xfd   : > { %vm1990_vm4 = vmneg %vm1212_vm2  ;;  %1652 = vmatpush.bf16.msrb.mxu2 %v2212_v60  ;;  %v2260_v60 = vld [vmem:[%s2992_s18] ss:$0 sm:$0xff] }
  0xfe   : > { %vm1991_vm5 = vmpackc.low %vm1989_vm3, %vm1990_vm4  ;;  %1548 = vmatpush.bf16.msrb.mxu1 %v2206_v47 }
  0xff   : > { %1993 = vmatmul.msk.bf16.vlgmr.msra.gmra.mxu2 %vm1991_vm5, %v1992_v1  ;;  %1373 = vmatpush.bf16.msra.mxu3 %v2185_v20  ;;  %v2203_v1 = vld [vmem:[%s2985_s11 + $0x20] sm:$0xff] }
 0x100   : > { %1469 = vmatpush.bf16.msrb.mxu0 %v2194_v56 }
 0x101   : > { %1653 = vmatpush.bf16.msrb.mxu2 %v2211_v3  ;;  %v2261_v3 = vld [vmem:[%s2993_s19] ss:$0 sm:$0xff] }
 0x102   : > { %1549 = vmatpush.bf16.msrb.mxu1 %v2205_v35  ;;  %v2263_v35 = vld [vmem:[#allocation3] ss:$0 sm:$0xff] }
 0x103   : > { %1374 = vmatpush.bf16.msra.mxu3 %v2184_v50 }
 0x104   : > { %1470 = vmatpush.bf16.msrb.mxu0 %v2193_v51 }
 0x105   : > { %1654 = vmatpush.bf16.msrb.mxu2 %v2210_v30 }
 0x106   : > { %1550 = vmatpush.bf16.msrb.mxu1 %v2204_v5 }
 0x107   : > { %1375 = vmatpush.bf16.msra.mxu3 %v2183_v41 }
 0x108   : > { %1471 = vmatpush.bf16.msrb.mxu0 %v2192_v36 }
 0x109   : > { %1655 = vmatpush.bf16.msrb.mxu2 %v2209_v39 }
 0x10a   : > { %1551 = vmatpush.bf16.msrb.mxu1 %v2203_v1 }
 0x10b   : > { %1733 = vmatpush.bf16.msrb.mxu3 %v2222_v17 }
 0x10c   : > { %1472 = vmatpush.bf16.msrb.mxu0 %v2191_v7 }
 0x10d   : > { %1656 = vmatpush.bf16.msrb.mxu2 %v2208_v43  ;;  %v2262_v43 = vld [vmem:[#allocation2] ss:$0 sm:$0xff] }
 0x10e   : > { %1552 = vmatpush.bf16.msrb.mxu1 %v2202_v18 }
 0x111   : > { %1657 = vmatpush.bf16.msrb.mxu2 %v2207_v8 }
 0x14f   : > { %v993_v58 = vpop.permute.xlu2 %992 }
 0x156   : > { %v898_v23 = vpop.f32.mrf.mxu0 }
 0x157   : > { %v903_v61 = vmax.f32 %v898_v23, 0.0  ;;  %v2201_v23 = vld [vmem:[%s2985_s11 + $0x10] sm:$0xff] }
 0x158   : > { %1553 = vmatpush.bf16.msrb.mxu1 %v2201_v23 }
 0x15c   : > { %1554 = vmatpush.bf16.msrb.mxu1 %v2200_v15 }
 0x15e   : > { %v900_v16 = vpop.f32.mrf.mxu0 }
 0x15f   : > { %v904_v46 = vmax.f32 %v900_v16, 0.0 }
 0x161   : > { %v905_v37 = vpack.c.bf16 %v904_v46, %v903_v61 }
 0x163   : > { %982 = vmatmul.bf16.vlgmr.msra.gmra.mxu1 %v905_v37 }
 0x182   : > { %v1292_v29 = vpop.f32.mrf.mxu2 }
 0x183   : > { %v1297_v52 = vmax.f32 %v1292_v29, 0.0  ;;  %v2199_v29 = vld [vmem:[%s2985_s11] sm:$0xff] }
 0x184   : > { %1555 = vmatpush.bf16.msrb.mxu1 %v2199_v29 }
 0x18a   : > { %v1294_v63 = vpop.f32.mrf.mxu2 }
 0x18b   : > { %v1298_v54 = vmax.f32 %v1294_v63, 0.0  ;;  %v2221_v63 = vld [vmem:[%s2991_s17 + $0x30] sm:$0xff] }
 0x18c   : > { %1734 = vmatpush.bf16.msrb.mxu3 %v2221_v63 }
 0x18d   : > { %v1299_v38 = vpack.c.bf16 %v1298_v54, %v1297_v52  ;;  %v2220_v52 = vld [vmem:[%s2991_s17 + $0x28] sm:$0xff]  ;;  %v2219_v54 = vld [vmem:[%s2991_s17 + $0x20] sm:$0xff] }
 0x18f   : > { %1376 = vmatmul.bf16.vlgmr.msra.gmra.mxu3 %v1299_v38  ;;  %v2218_v38 = vld [vmem:[%s2991_s17 + $0x18] sm:$0xff] }
 0x190   : > { %1735 = vmatpush.bf16.msrb.mxu3 %v2220_v52 }
 0x194   : > { %1736 = vmatpush.bf16.msrb.mxu3 %v2219_v54 }
 0x198   : > { %1737 = vmatpush.bf16.msrb.mxu3 %v2218_v38 }
 0x19c   : > { %1738 = vmatpush.bf16.msrb.mxu3 %v2217_v42 }
 0x1e0   : > { %v983_v34 = vpop.f32.mrf.mxu1 }
 0x1e1   : > { %v984_v40 = vadd.f32 %v2254_v57, %v983_v34  ;;  %v2216_v34 = vld [vmem:[%s2991_s17 + $0x8] sm:$0xff] }
 0x1e2   : > { %1739 = vmatpush.bf16.msrb.mxu3 %v2216_v34 }
 0x1e3   : > { %v988_v0 = vmax.f32 %v984_v40, 0.0  ;;  %v2215_v40 = vld [vmem:[%s2991_s17] sm:$0xff] }
 0x1e5   : > { %v995_v33 = vmul.f32 %v993_v58, %v988_v0 }
 0x1e6   : > { %1740 = vmatpush.bf16.msrb.mxu3 %v2215_v40 }
 0x1e7   : > { %v996_v4 = vrot.slane %v995_v33, 4 }
 0x1e8   : > { %v985_v11 = vpop.f32.mrf.mxu1 }
 0x1e9   : > { %v997_v19 = vadd.f32 %v996_v4, %v995_v33  ;;  %v986_v62 = vadd.f32 %v2254_v57, %v985_v11 }
 0x1eb   : > { %v998_v59 = vrot.slane %v997_v19, 2  ;;  %v989_v48 = vmax.f32 %v986_v62, 0.0 }
 0x1ed   : > { %v999_v6 = vadd.f32 %v998_v59, %v997_v19  ;;  %v2258_v59 = vld [vmem:[%s2986_s12] ss:$0 sm:$0xff] }
 0x1ef   : > { %v1000_v44 = vrot.slane %v999_v6, 1 }
 0x1f1   : > { %v1001_v10 = vadd.f32 %v1000_v44, %v999_v6  ;;  %v2259_v44 = vld [vmem:[%s2987_s13] ss:$0 sm:$0xff] }
 0x1f3   : > { %v1391_v26 = vadd.f32 %v1001_v10, %v989_v48 }
 0x1f5   : > { %v1393_v27 = vrot.slane %v1391_v26, 7 }
 0x1f7   : > { %v1395_v45 = vsel %vm1012_vm0, %v1001_v10, %v1393_v27 }
 0x1f8   : > { %v1396_v22 = vpack.c.bf16 %v1395_v45, %v1395_v45 }
 0x1fa   : > { %1473 = vmatmul.bf16.vlgmr.msrb.gmra.mxu0 %v1396_v22 }
 0x212   : > { %v1377_v12 = vpop.f32.mrf.mxu3 }
 0x213   : > { %v1378_v14 = vadd.f32 %v2255_v55, %v1377_v12 }
 0x215   : > { %v1382_v28 = vmax.f32 %v1378_v14, 0.0 }
 0x217   : > { %v1384_v32 = vmul.f32 %v1382_v28, %v993_v58  ;;  %v2257_v58 = vld [vmem:[%s2990_s16] ss:$0 sm:$0xff] }
 0x219   : > { %v1385_v2 = vrot.slane %v1384_v32, 4 }
 0x21a   : > { %v1379_v24 = vpop.f32.mrf.mxu3 }
 0x21b   : > { %v1386_v9 = vadd.f32 %v1385_v2, %v1384_v32  ;;  %v1380_v61 = vadd.f32 %v2255_v55, %v1379_v24 }
 0x21d   : > { %v1387_v31 = vrot.slane %v1386_v9, 2  ;;  %v1383_v46 = vmax.f32 %v1380_v61, 0.0 }
 0x21f   : > { %v1388_v16 = vadd.f32 %v1387_v31, %v1386_v9 }
 0x221   : > { %v1389_v20 = vrot.slane %v1388_v16, 1 }
 0x223   : > { %v1390_v50 = vadd.f32 %v1389_v20, %v1388_v16 }
 0x225   : > { %v1576_v37 = vadd.f32 %v1390_v50, %v1383_v46 }
 0x227   : > { %v1578_v41 = vrot.slane %v1576_v37, 7 }
 0x229   : > { %v1580_v49 = vsel %vm1012_vm0, %v1390_v50, %v1578_v41 }
 0x22a   : > { %v1581_v13 = vpack.c.bf16 %v1580_v49, %v1580_v49 }
 0x22c   : > { %1658 = vmatmul.bf16.vlgmr.msrb.gmra.mxu2 %v1581_v13 }
 0x277   : > { %v1474_v25 = vpop.f32.mrf.mxu0 }
 0x278   : > { %v1475_v56 = vadd.f32 %v2256_v21, %v1474_v25 }
 0x27a   : > { %v1478_v51 = vmax.f32 %v1475_v56, 0.0 }
 0x27c   : > { %v1479_v53 = vpack.c.bf16 %v1478_v51, %v1478_v51 }
 0x27e   : > { %1556 = vmatmul.bf16.vlgmr.msrb.gmra.mxu1 %v1479_v53 }
 0x27f   : > { %v1476_v57 = vpop.f32.mrf.mxu0 }
 0x2af   : > { %v1659_v0 = vpop.f32.mrf.mxu2 }
 0x2b0   : > { %v1660_v33 = vadd.f32 %v2257_v58, %v1659_v0 }
 0x2b2   : > { %v1663_v4 = vmax.f32 %v1660_v33, 0.0 }
 0x2b4   : > { %v1664_v11 = vpack.c.bf16 %v1663_v4, %v1663_v4 }
 0x2b6   : > { %1741 = vmatmul.bf16.vlgmr.msrb.gmra.mxu3 %v1664_v11 }
 0x2b7   : > { %v1661_v19 = vpop.f32.mrf.mxu2 }
 0x2fb   : > { %v1557_v62 = vpop.f32.mrf.mxu1 }
 0x2fc   : > { %v1558_v6 = vadd.f32 %v2258_v59, %v1557_v62 }
 0x2fe   : > { %v1561_v48 = vmax.f32 %v1558_v6, 0.0 }
 0x300   : > { %v1566_v10 = vmul.f32 %v2259_v44, %v1561_v48 }
 0x302   : > { %v1568_v36 = vsel %vm1567_vm6, %v1566_v10, 0.0 }
 0x303   : > { %v1559_v26 = vpop.f32.mrf.mxu1  ;;  %1569 = vadd.xlane.f32.xlu0 %v1568_v36 }
 0x339   : > { %v1742_v27 = vpop.f32.mrf.mxu3 }
 0x33a   : > { %v1743_v7 = vadd.f32 %v2260_v60, %v1742_v27 }
 0x33c   : > { %v1746_v45 = vmax.f32 %v1743_v7, 0.0 }
 0x33e   : > { %v1751_v22 = vmul.f32 %v2261_v3, %v1746_v45 }
 0x340   : > { %v1752_v30 = vsel %vm1567_vm6, %v1751_v22, 0.0 }
 0x341   : > { %v1744_v39 = vpop.f32.mrf.mxu3  ;;  %1753 = vadd.xlane.f32.xlu1 %v1752_v30 }
 0x376   : > { %v1570_v8 = vpop.xlane.xlu0 %1569 }
 0x377   : > { %v1575_v47 = vadd.f32 %v2262_v43, %v1570_v8 }
 0x379   : > { %v1761_v55 = vrot.slane %v1575_v47, 7 }
 0x37b   : > { %v1763_v14 = vsub.f32 %v1575_v47, %v1761_v55 }
 0x37d   : > { %v1764_v32 = vmul.f32 0.7, %v1763_v14 }
 0x3b4   : > { %v1754_v12 = vpop.xlane.xlu1 %1753 }
 0x3b5   : > { %v1759_v5 = vadd.f32 %v2263_v35, %v1754_v12 }
 0x3b7   : > { %v1766_v28 = vrot.slane %v1759_v5, 7 }
 0x3b9   : > { %v1768_v1 = vsub.f32 %v1759_v5, %v1766_v28 }
 0x3bb   : > { %v1769_v2 = vmul.f32 0.3, %v1768_v1 }
 0x3bd   : > { %v1770_v18 = vadd.f32 %v1769_v2, %v1764_v32 }
 0x3bf   : > { %v1772_v9 = vrot.slane %v1770_v18, 1 }
 0x3c1   : > { %2225 = vpush %v1772_v9 }
 0x3f2   : > { %s2226_s22 = spop %2225 }
 0x3f3   : > { %v1774_v24 = vstv %s2226_s22 }
 0x3f4   : > { %1776 = vst [vmem:[%s815_s3] sm:$0xff] %v1774_v24 }
 0x3f5 PF: > { %p32_p9 = scmp.ge.s32.totalorder %s2426_s20, 4   ;;  %s3026_s3 = smov %s2286_s28 }
 0x3f6   : > { %s3027_s28 = smov %s2435_s30  ;;  %s3028_s29 = smov %s2426_s20 }
 0x3f7   :  { %34 = sbr.rel (!%p32_p9) target bundleno = 9 (0x9), region = 195 }

</bundles_post_ra>
